<compile_context>
chip_gen: v7x
topology: tpu7x:2x2x1
jax: 0.10.0
libtpu: 0.0.40
codegen_flags: <defaults>
</compile_context>

<pallas_src>
import functools

import jax
import jax.numpy as jnp
from jax.experimental import pallas as pl
from jax.experimental.pallas import tpu as pltpu

# ----------------------- architecture constants (from the PyTorch module) -----
C1, K1, S1, P1 = 50, 36, 16, 9       # convE1 = Conv1d(1, 50, 36, 16, 9)
C2, K2, S2, P2 = 40, 4, 3, 2         # convE2 = Conv1d(50, 40, 4, 3, 2)
C3, K3, S3, P3 = 20, 4, 2, 0         # convD1 = ConvTranspose1d(40, 20, 4, 2)
C4, K4, S4, P4 = 1, 40, 36, 18       # convD2 = ConvTranspose1d(20, 1, 40, 36, 18)


def _round_up(v, m):
    return ((v + m - 1) // m) * m


def _lengths(L_in):
    L1 = (L_in + 2 * P1 - K1) // S1 + 1     # convE1 output length
    LP = L1 // 2                            # after MaxPool1d(2, 2) (floor mode)
    L2 = (LP + 2 * P2 - K2) // S2 + 1       # convE2 output length (encoded)
    L3 = (L2 - 1) * S3 - 2 * P3 + K3        # convD1 output length
    L4 = (L3 - 1) * S4 - 2 * P4 + K4        # convD2 output length (decoded)
    return L1, LP, L2, L3, L4


def _dims(L_in):
    _, LP, L2, L3, L4 = _lengths(L_in)
    D1 = _round_up(C1 * LP, 128)            # padded width of a1 per pooling tap
    D2 = _round_up(C2 * L2, 128)            # padded encoded width
    D3 = _round_up(C3 * L3, 128)            # padded d1 width
    D4 = L4                                 # decoded width (already 256)
    return D1, D2, D3, D4


# ------------------------------------------------------------- weight packing
def pack_params(params, L_in):
    """Pre-pack every conv / deconv into a dense, lane-aligned GEMM matrix.

    Column layout of every activation is channel-major (col = channel*L + pos,
    i.e. row-major flatten of PyTorch (N, C, L)), padded to a multiple of 128
    with zero weight columns / zero bias so the padding stays exactly zero
    through ReLU and contributes nothing downstream.
    """
    _, LP, L2, L3, L4 = _lengths(L_in)
    D1, D2, D3, D4 = _dims(L_in)

    # convE1 + fused MaxPool(2,2): even/odd pooling-tap band GEMMs, fused into
    # one GEMM by column concatenation (each half padded to D1 lanes).
    w1 = params["wE1"][:, 0, :]                          # (C1, K1)
    i = jnp.arange(L_in)[:, None]
    t = jnp.arange(LP)[None, :]

    def band1(extra):
        k = i + P1 - (2 * t + extra) * S1                # (L_in, LP)
        valid = (k >= 0) & (k < K1)
        vals = jnp.where(valid[None], w1[:, jnp.clip(k, 0, K1 - 1)], 0.0)
        m = jnp.transpose(vals, (1, 0, 2)).reshape(L_in, C1 * LP)
        return jnp.pad(m, ((0, 0), (0, D1 - C1 * LP)))

    W1 = jnp.concatenate([band1(0), band1(1)], axis=1)   # (L_in, 2*D1)
    b1 = jnp.pad(jnp.repeat(params["bE1"], LP), (0, D1 - C1 * LP))
    B1 = jnp.concatenate([b1, b1])                       # (2*D1,)

    # convE2: Conv1d(50, 40, 4, stride 3, pad 2) as one banded GEMM.
    w2 = params["wE2"]                                   # (C2, C1, K2)
    tt = jnp.arange(LP)[:, None]
    l2 = jnp.arange(L2)[None, :]
    k = tt + P2 - S2 * l2                                # (LP, L2)
    valid = (k >= 0) & (k < K2)
    vals = jnp.where(valid[None, None], w2[:, :, jnp.clip(k, 0, K2 - 1)], 0.0)
    W2 = jnp.transpose(vals, (1, 2, 0, 3)).reshape(C1 * LP, C2 * L2)
    W2 = jnp.pad(W2, ((0, D1 - C1 * LP), (0, D2 - C2 * L2)))
    B2 = jnp.pad(jnp.repeat(params["bE2"], L2), (0, D2 - C2 * L2))

    # convD1: ConvTranspose1d(40, 20, 4, stride 2) as one dense GEMM.
    w3 = params["wD1"]                                   # (C2, C3, K3)
    ll = jnp.arange(L2)[:, None]
    j = jnp.arange(L3)[None, :]
    k = j + P3 - S3 * ll                                 # (L2, L3)
    valid = (k >= 0) & (k < K3)
    vals = jnp.where(valid[None, None], w3[:, :, jnp.clip(k, 0, K3 - 1)], 0.0)
    W3 = jnp.transpose(vals, (0, 2, 1, 3)).reshape(C2 * L2, C3 * L3)
    W3 = jnp.pad(W3, ((0, D2 - C2 * L2), (0, D3 - C3 * L3)))
    B3 = jnp.pad(jnp.repeat(params["bD1"], L3), (0, D3 - C3 * L3))

    # convD2: ConvTranspose1d(20, 1, 40, stride 36, pad 18) -> lane-dense (N, 256).
    # TODO(synk): in a compute-bound large-batch regime replace these ~13%-dense
    # band matrices with an im2col GEMM; at these sizes the padding is free.
    w4 = params["wD2"][:, 0, :]                          # (C3, K4)
    jj = jnp.arange(L3)[:, None]
    t4 = jnp.arange(L4)[None, :]
    k = t4 + P4 - S4 * jj                                # (L3, L4)
    valid = (k >= 0) & (k < K4)
    vals = jnp.where(valid[None], w4[:, jnp.clip(k, 0, K4 - 1)], 0.0)
    W4 = jnp.pad(vals.reshape(C3 * L3, L4), ((0, D3 - C3 * L3), (0, 0)))
    B4 = jnp.full((L4,), params["bD2"][0])

    # Single concatenated bias row: [B1 | B2 | B3 | B4], 128-aligned segments.
    Ball = jnp.concatenate([B1, B2, B3, B4])[None, :].astype(jnp.float32)

    return dict(W1=W1.astype(jnp.bfloat16), W2=W2.astype(jnp.bfloat16),
                W3=W3.astype(jnp.bfloat16), W4=W4.astype(jnp.bfloat16), B=Ball)


# --------------------------------------------------------------- fused kernel
def _fused_ann_kernel(x_ref, w1_ref, w2_ref, w3_ref, w4_ref, b_ref, out_ref,
                      *, D1, D2, D3, D4):
    f32 = jnp.float32
    bf16 = jnp.bfloat16
    x = x_ref[...].astype(bf16)                                        # (TB, L_in)

    # convE1 (even + odd pooling taps in ONE fused GEMM) + bias.
    h1 = jnp.dot(x, w1_ref[...], preferred_element_type=f32) + b_ref[:, 0:2 * D1]
    # MaxPool1d(2,2) then ReLU; ReLU is monotone so max(max(even,odd),0) is exact.
    a1 = jnp.maximum(jnp.maximum(h1[:, :D1], h1[:, D1:2 * D1]), 0.0)   # (TB, D1)
    # TODO(synk): nn.Dropout (do1) omitted -- eval/identity semantics.

    # convE2 -> ReLU (= encoded, channel-major flatten, zero-padded to D2 lanes).
    enc = jnp.maximum(
        jnp.dot(a1.astype(bf16), w2_ref[...], preferred_element_type=f32)
        + b_ref[:, 2 * D1:2 * D1 + D2], 0.0)                           # (TB, D2)

    # convD1 (ConvTranspose1d pre-packed as dense GEMM) -> ReLU.
    d1 = jnp.maximum(
        jnp.dot(enc.astype(bf16), w3_ref[...], preferred_element_type=f32)
        + b_ref[:, 2 * D1 + D2:2 * D1 + D2 + D3], 0.0)                 # (TB, D3)
    # TODO(synk): nn.Dropout (do2) omitted -- eval/identity semantics.

    # convD2 (= decoded), lane-dense 256-wide.
    dec = (jnp.dot(d1.astype(bf16), w4_ref[...], preferred_element_type=f32)
           + b_ref[:, 2 * D1 + D2 + D3:2 * D1 + D2 + D3 + D4])         # (TB, D4)

    # Single lane-padded output: [encoded (D2) | decoded (D4)], 128-aligned split.
    out_ref[:, 0:D2] = enc.astype(out_ref.dtype)
    out_ref[:, D2:D2 + D4] = dec.astype(out_ref.dtype)


def ann_forward(packed, x):
    N, cin, L_in = x.shape
    assert cin == 1
    _, _, L2, _, L4 = _lengths(L_in)
    D1, D2, D3, D4 = _dims(L_in)
    out_w = D2 + D4

    # Batch tiling: 8-row minimum (sublane), 256-row cap (v6e/v7x MXU height).
    TB = min(256, max(8, _round_up(N, 8)))
    N_pad = _round_up(N, TB)
    x2d = x.reshape(N, L_in).astype(jnp.float32)
    if N_pad != N:
        x2d = jnp.pad(x2d, ((0, N_pad - N), (0, 0)))

    kernel = functools.partial(_fused_ann_kernel, D1=D1, D2=D2, D3=D3, D4=D4)
    weight_spec = lambda shape: pl.BlockSpec(shape, lambda i: (0, 0))

    out = pl.pallas_call(
        kernel,
        out_shape=jax.ShapeDtypeStruct((N_pad, out_w), jnp.float32),
        grid=(N_pad // TB,),
        in_specs=[
            pl.BlockSpec((TB, L_in), lambda i: (i, 0)),       # x: streamed per tile
            weight_spec(packed["W1"].shape),                  # weights: VMEM-resident
            weight_spec(packed["W2"].shape),
            weight_spec(packed["W3"].shape),
            weight_spec(packed["W4"].shape),
            weight_spec(packed["B"].shape),
        ],
        out_specs=pl.BlockSpec((TB, out_w), lambda i: (i, 0)),
        compiler_params=pltpu.CompilerParams(dimension_semantics=("parallel",)),
    )(x2d, packed["W1"], packed["W2"], packed["W3"], packed["W4"], packed["B"])

    encoded = out[:N, :C2 * L2].reshape(N, C2, L2)            # (N, 40, 3)  NCL
    decoded = out[:N, D2:D2 + L4].reshape(N, C4, L4)          # (N, 1, 256) NCL
    return encoded, decoded


# ------------------------------------------------------------------ parameters
def init_params(key):
    def uniform(k, shape, fan_in):
        bound = 1.0 / jnp.sqrt(fan_in)
        return jax.random.uniform(k, shape, jnp.float32, -bound, bound)

    ks = jax.random.split(key, 8)
    return {
        "wE1": uniform(ks[0], (C1, 1, K1), 1 * K1), "bE1": uniform(ks[1], (C1,), 1 * K1),
        "wE2": uniform(ks[2], (C2, C1, K2), C1 * K2), "bE2": uniform(ks[3], (C2,), C1 * K2),
        "wD1": uniform(ks[4], (C2, C3, K3), C3 * K3), "bD1": uniform(ks[5], (C3,), C3 * K3),
        "wD2": uniform(ks[6], (C3, C4, K4), C4 * K4), "bD2": uniform(ks[7], (C4,), C4 * K4),
    }


# ------------------------------------------------ plain-XLA reference (checks)
def _ref_conv1d(x, w, b, stride, padding):
    out = jax.lax.conv_general_dilated(
        x, w, window_strides=(stride,), padding=[(padding, padding)],
        dimension_numbers=("NCH", "OIH", "NCH"),
        precision=jax.lax.Precision.HIGHEST)
    return out + b[None, :, None]


def _ref_conv_transpose1d(x, w, b, stride, padding):
    K = w.shape[2]
    w_eq = jnp.flip(jnp.transpose(w, (1, 0, 2)), axis=2)
    out = jax.lax.conv_general_dilated(
        x, w_eq, window_strides=(1,), padding=[(K - 1 - padding, K - 1 - padding)],
        lhs_dilation=(stride,), dimension_numbers=("NCH", "OIH", "NCH"),
        precision=jax.lax.Precision.HIGHEST)
    return out + b[None, :, None]


def ref_forward(params, x):
    x = _ref_conv1d(x, params["wE1"], params["bE1"], S1, P1)
    Lp = x.shape[-1] // 2
    x = jnp.maximum(jnp.maximum(x[:, :, 0:2 * Lp:2], x[:, :, 1:2 * Lp:2]), 0.0)
    encoded = jnp.maximum(_ref_conv1d(x, params["wE2"], params["bE2"], S2, P2), 0.0)
    x = jnp.maximum(_ref_conv_transpose1d(encoded, params["wD1"], params["bD1"], S3, P3), 0.0)
    decoded = _ref_conv_transpose1d(x, params["wD2"], params["bD2"], S4, P4)
    return encoded, decoded


# ------------------------------------------------------------------------ main
if __name__ == "__main__":
    key = jax.random.PRNGKey(0)
    pkey, xkey = jax.random.split(key)
    params = init_params(pkey)

    # Input: (batch=2, channels=1, length=274) -> encoded (2,40,3), decoded (2,1,256)
    x = jax.random.normal(xkey, (2, 1, 274), jnp.float32)

    packed = pack_params(params, x.shape[-1])          # one-time weight packing
    fwd = jax.jit(ann_forward)
    encoded, decoded = fwd(packed, x)
    jax.block_until_ready((encoded, decoded))

    assert encoded.shape == (2, 40, 3), encoded.shape
    assert decoded.shape == (2, 1, 256), decoded.shape

    # Cross-check against an exact-precision plain-XLA reference of the forward.
    enc_ref, dec_ref = jax.jit(ref_forward)(params, x)
    jax.block_until_ready((enc_ref, dec_ref))
    err_enc = float(jnp.max(jnp.abs(encoded - enc_ref)))
    err_dec = float(jnp.max(jnp.abs(decoded - dec_ref)))
    assert err_enc < 2e-2 and err_dec < 2e-2, (err_enc, err_dec)

    print("KERNEL_OK")
</pallas_src>

<mosaic_0001>
module attributes {stable_mosaic.version = 11 : i64} {
  func.func @_fused_ann_kernel(%arg0: i32, %arg1: memref<8x274xf32, #tpu.memory_space<vmem>>, %arg2: memref<274x1024xbf16, #tpu.memory_space<vmem>>, %arg3: memref<512x128xbf16, #tpu.memory_space<vmem>>, %arg4: memref<128x256xbf16, #tpu.memory_space<vmem>>, %arg5: memref<256x256xbf16, #tpu.memory_space<vmem>>, %arg6: memref<1x1664xf32, #tpu.memory_space<vmem>>, %arg7: memref<8x384xf32, #tpu.memory_space<vmem>>) attributes {dimension_semantics = [#tpu.dimension_semantics<parallel>], iteration_bounds = array<i64: 1>, scalar_prefetch = 0 : i64, scratch_operands = 0 : i64, tpu.core_type = #tpu.core_type<tc>, window_params = [{transform_indices = @transform_0, window_bounds = array<i64: 8, 274>}, {pipeline_mode = #tpu.pipeline_mode<synchronous>, transform_indices = @transform_1, window_bounds = array<i64: 274, 1024>}, {pipeline_mode = #tpu.pipeline_mode<synchronous>, transform_indices = @transform_2, window_bounds = array<i64: 512, 128>}, {pipeline_mode = #tpu.pipeline_mode<synchronous>, transform_indices = @transform_3, window_bounds = array<i64: 128, 256>}, {pipeline_mode = #tpu.pipeline_mode<synchronous>, transform_indices = @transform_4, window_bounds = array<i64: 256, 256>}, {pipeline_mode = #tpu.pipeline_mode<synchronous>, transform_indices = @transform_5, window_bounds = array<i64: 1, 1664>}, {transform_indices = @transform_6, window_bounds = array<i64: 8, 384>}]} {
    %c0 = arith.constant 0 : index
    %c0_0 = arith.constant 0 : index
    %0 = vector.load %arg1[%c0, %c0_0] : memref<8x274xf32, #tpu.memory_space<vmem>>, vector<8x274xf32>
    %1 = arith.truncf %0 : vector<8x274xf32> to vector<8x274xbf16>
    %c0_1 = arith.constant 0 : index
    %c0_2 = arith.constant 0 : index
    %2 = vector.load %arg2[%c0_1, %c0_2] : memref<274x1024xbf16, #tpu.memory_space<vmem>>, vector<274x1024xbf16>
    %cst = arith.constant dense<0.000000e+00> : vector<8x1024xf32>
    %3 = tpu.matmul %1, %2, %cst {dimension_numbers = #tpu.dot_dimension_numbers<[1], [0], [0], [1], [0, 0, 1, 1], [], []>} : vector<8x274xbf16>, vector<274x1024xbf16>, vector<8x1024xf32> -> vector<8x1024xf32>
    %c0_3 = arith.constant 0 : index
    %c0_4 = arith.constant 0 : index
    %4 = vector.load %arg6[%c0_3, %c0_4] : memref<1x1664xf32, #tpu.memory_space<vmem>>, vector<1x1024xf32>
    %5 = vector.broadcast %4 : vector<1x1024xf32> to vector<8x1024xf32>
    %6 = arith.addf %3, %5 : vector<8x1024xf32>
    %7 = vector.extract_strided_slice %6 {offsets = [0, 0], sizes = [8, 512], strides = [1, 1]} : vector<8x1024xf32> to vector<8x512xf32>
    %8 = vector.extract_strided_slice %6 {offsets = [0, 512], sizes = [8, 512], strides = [1, 1]} : vector<8x1024xf32> to vector<8x512xf32>
    %9 = arith.maximumf %7, %8 : vector<8x512xf32>
    %cst_5 = arith.constant 0.000000e+00 : f32
    %10 = vector.broadcast %cst_5 : f32 to vector<8x512xf32>
    %11 = arith.maximumf %9, %10 : vector<8x512xf32>
    %12 = arith.truncf %11 : vector<8x512xf32> to vector<8x512xbf16>
    %c0_6 = arith.constant 0 : index
    %c0_7 = arith.constant 0 : index
    %13 = vector.load %arg3[%c0_6, %c0_7] : memref<512x128xbf16, #tpu.memory_space<vmem>>, vector<512x128xbf16>
    %cst_8 = arith.constant dense<0.000000e+00> : vector<8x128xf32>
    %14 = tpu.matmul %12, %13, %cst_8 {dimension_numbers = #tpu.dot_dimension_numbers<[1], [0], [0], [1], [0, 0, 1, 1], [], []>} : vector<8x512xbf16>, vector<512x128xbf16>, vector<8x128xf32> -> vector<8x128xf32>
    %c0_9 = arith.constant 0 : index
    %c1024 = arith.constant 1024 : index
    %15 = vector.load %arg6[%c0_9, %c1024] : memref<1x1664xf32, #tpu.memory_space<vmem>>, vector<1x128xf32>
    %16 = vector.broadcast %15 : vector<1x128xf32> to vector<8x128xf32>
    %17 = arith.addf %14, %16 : vector<8x128xf32>
    %cst_10 = arith.constant 0.000000e+00 : f32
    %18 = vector.broadcast %cst_10 : f32 to vector<8x128xf32>
    %19 = arith.maximumf %17, %18 : vector<8x128xf32>
    %20 = arith.truncf %19 : vector<8x128xf32> to vector<8x128xbf16>
    %c0_11 = arith.constant 0 : index
    %c0_12 = arith.constant 0 : index
    %21 = vector.load %arg4[%c0_11, %c0_12] : memref<128x256xbf16, #tpu.memory_space<vmem>>, vector<128x256xbf16>
    %cst_13 = arith.constant dense<0.000000e+00> : vector<8x256xf32>
    %22 = tpu.matmul %20, %21, %cst_13 {dimension_numbers = #tpu.dot_dimension_numbers<[1], [0], [0], [1], [0, 0, 1, 1], [], []>} : vector<8x128xbf16>, vector<128x256xbf16>, vector<8x256xf32> -> vector<8x256xf32>
    %c0_14 = arith.constant 0 : index
    %c1152 = arith.constant 1152 : index
    %23 = vector.load %arg6[%c0_14, %c1152] : memref<1x1664xf32, #tpu.memory_space<vmem>>, vector<1x256xf32>
    %24 = vector.broadcast %23 : vector<1x256xf32> to vector<8x256xf32>
    %25 = arith.addf %22, %24 : vector<8x256xf32>
    %cst_15 = arith.constant 0.000000e+00 : f32
    %26 = vector.broadcast %cst_15 : f32 to vector<8x256xf32>
    %27 = arith.maximumf %25, %26 : vector<8x256xf32>
    %28 = arith.truncf %27 : vector<8x256xf32> to vector<8x256xbf16>
    %c0_16 = arith.constant 0 : index
    %c0_17 = arith.constant 0 : index
    %29 = vector.load %arg5[%c0_16, %c0_17] : memref<256x256xbf16, #tpu.memory_space<vmem>>, vector<256x256xbf16>
    %cst_18 = arith.constant dense<0.000000e+00> : vector<8x256xf32>
    %30 = tpu.matmul %28, %29, %cst_18 {dimension_numbers = #tpu.dot_dimension_numbers<[1], [0], [0], [1], [0, 0, 1, 1], [], []>} : vector<8x256xbf16>, vector<256x256xbf16>, vector<8x256xf32> -> vector<8x256xf32>
    %c0_19 = arith.constant 0 : index
    %c1408 = arith.constant 1408 : index
    %31 = vector.load %arg6[%c0_19, %c1408] : memref<1x1664xf32, #tpu.memory_space<vmem>>, vector<1x256xf32>
    %32 = vector.broadcast %31 : vector<1x256xf32> to vector<8x256xf32>
    %33 = arith.addf %30, %32 : vector<8x256xf32>
    %c0_20 = arith.constant 0 : index
    %c0_21 = arith.constant 0 : index
    %34 = vector.load %arg7[%c0_20, %c0_21] : memref<8x384xf32, #tpu.memory_space<vmem>>, vector<8x128xf32>
    tpu.vector_store %arg7[%c0_20, %c0_21], %19 {strides = array<i32>} : memref<8x384xf32, #tpu.memory_space<vmem>>, vector<8x128xf32>,
    %c0_22 = arith.constant 0 : index
    %c128 = arith.constant 128 : index
    %35 = vector.load %arg7[%c0_22, %c128] : memref<8x384xf32, #tpu.memory_space<vmem>>, vector<8x256xf32>
    tpu.vector_store %arg7[%c0_22, %c128], %33 {strides = array<i32>} : memref<8x384xf32, #tpu.memory_space<vmem>>, vector<8x256xf32>,
    return
  }
  func.func @transform_0(%arg0: i32) -> (i32, i32) {
    %c0_i32 = arith.constant 0 : i32
    %c0_i32_0 = arith.constant 0 : i32
    return %arg0, %c0_i32 : i32, i32
  }
  func.func @transform_1(%arg0: i32) -> (i32, i32) {
    %c0_i32 = arith.constant 0 : i32
    %c0_i32_0 = arith.constant 0 : i32
    %c0_i32_1 = arith.constant 0 : i32
    return %c0_i32, %c0_i32_0 : i32, i32
  }
  func.func @transform_2(%arg0: i32) -> (i32, i32) {
    %c0_i32 = arith.constant 0 : i32
    %c0_i32_0 = arith.constant 0 : i32
    %c0_i32_1 = arith.constant 0 : i32
    return %c0_i32, %c0_i32_0 : i32, i32
  }
  func.func @transform_3(%arg0: i32) -> (i32, i32) {
    %c0_i32 = arith.constant 0 : i32
    %c0_i32_0 = arith.constant 0 : i32
    %c0_i32_1 = arith.constant 0 : i32
    return %c0_i32, %c0_i32_0 : i32, i32
  }
  func.func @transform_4(%arg0: i32) -> (i32, i32) {
    %c0_i32 = arith.constant 0 : i32
    %c0_i32_0 = arith.constant 0 : i32
    %c0_i32_1 = arith.constant 0 : i32
    return %c0_i32, %c0_i32_0 : i32, i32
  }
  func.func @transform_5(%arg0: i32) -> (i32, i32) {
    %c0_i32 = arith.constant 0 : i32
    %c0_i32_0 = arith.constant 0 : i32
    %c0_i32_1 = arith.constant 0 : i32
    return %c0_i32, %c0_i32_0 : i32, i32
  }
  func.func @transform_6(%arg0: i32) -> (i32, i32) {
    %c0_i32 = arith.constant 0 : i32
    %c0_i32_0 = arith.constant 0 : i32
    return %arg0, %c0_i32 : i32, i32
  }
}

</mosaic_0001>

<bundles_post_ra>
// kernel: ann_forward.1
= control target key start
LH: loop header
LB: loop body
LE: loop exit
PB: predicated region body
PF: predicated region fallthrough
CT: control target
= control target key end

     0   :  { %11 = vsyncpa [#allocation3], 0  ;;  %s2781_s0 = inlined_call_operand.vmem [shape: f32[8,274], index: 0, kind: input, shape index: {}]   ;;  %s2782_s1 = inlined_call_operand.hbm [shape: bf16[274,1024], index: 1, kind: input, shape index: {}]   ;;  %s2783_s2 = inlined_call_operand.hbm [shape: bf16[512,128], index: 2, kind: input, shape index: {}]   ;;  %s2784_s3 = inlined_call_operand.hbm [shape: bf16[128,256], index: 3, kind: input, shape index: {}]   ;;  %s2785_s4 = inlined_call_operand.hbm [shape: bf16[256,256], index: 4, kind: input, shape index: {}]   ;;  %s2786_s5 = inlined_call_operand.vmem [shape: f32[1,1664], index: 5, kind: input, shape index: {}]   ;;  %s2787_s6 = inlined_call_operand.vmem [shape: f32[8,384], index: 6, kind: output, shape index: {}]  }
   0x1   :  { %12 = vsyncpa [#allocation5], 0 }
   0x2   :  { %13 = vsyncpa [#allocation8], 0  ;;  %s2603_s21 = smov [#allocation4]   ;;  %s2509_s25 = scalar_lea.hbm %s2783_s2, 4096 }
   0x3   :  { %s33_s22 = sshll.u32 %s2603_s21, 4  ;;  %p2510_p0 = scmp.ne.s32.totalorder %s2783_s2, %s2509_s25  ;;  %s34_s22 = int_to_ptr.vmem [resolvable:$true] %s33_s22 }
   0x4   :  { %p2513_p1 = scmp.lt.u32.totalorder %s2509_s25, %s2783_s2 }
   0x6   :  { %p2515_p2 = pnand %p2513_p1, %p2510_p0 }
   0x8   :  { %2518 = shalt.err (!%p2515_p2)
}
   0x9   :  { %s2519_s30 = scalar_lea.vmem %s34_s22, 4096  ;;  %p2524_p4 = scmp.lt.s32.totalorder %s34_s22, %s34_s22 }
   0xa   :  { %p2520_p3 = scmp.ne.s32.totalorder %s34_s22, %s2519_s30  ;;  %p2525_p5 = scmp.lt.s32.totalorder %s2519_s30, %s2519_s30 }
   0xc   :  { %p2526_p6 = por %p2525_p5, %p2524_p4 }
   0xe   :  { %p2527_p7 = pnand %p2526_p6, %p2520_p3 }
  0x10   :  { %2530 = shalt.err (!%p2527_p7)
}
  0x11   :  { %s2604_s7 = smov 64   ;;  %s2605_s8 = smov 4  }
  0x12   :  { %39 = dma.hbm_to_vmem [thread:$0]  %s2783_s2, 4096, %s34_s22, [#allocation5], %s2604_s7, %s2604_s7, %s2605_s8  }
  0x13   :  { %s2606_s11 = smov [#allocation2]   ;;  %s2531_s15 = scalar_lea.hbm %s2782_s1, 17920 }
  0x14   :  { %s21_s12 = sshll.u32 %s2606_s11, 4  ;;  %p2532_p8 = scmp.ne.s32.totalorder %s2782_s1, %s2531_s15  ;;  %s22_s12 = int_to_ptr.vmem [resolvable:$true] %s21_s12 }
  0x15   :  { %p2535_p9 = scmp.lt.u32.totalorder %s2531_s15, %s2782_s1 }
  0x17   :  { %p2537_p10 = pnand %p2535_p9, %p2532_p8 }
  0x19   :  { %2540 = shalt.err (!%p2537_p10)
}
  0x1a   :  { %s2541_s20 = scalar_lea.vmem %s22_s12, 17920  ;;  %p2546_p12 = scmp.lt.s32.totalorder %s22_s12, %s22_s12 }
  0x1b   :  { %p2542_p11 = scmp.ne.s32.totalorder %s22_s12, %s2541_s20  ;;  %p2547_p13 = scmp.lt.s32.totalorder %s2541_s20, %s2541_s20 }
  0x1d   :  { %p2548_p0 = por %p2547_p13, %p2546_p12 }
  0x1f   :  { %p2549_p1 = pnand %p2548_p0, %p2542_p11 }
  0x21   :  { %2552 = shalt.err (!%p2549_p1)
}
  0x22   :  { %s2607_s2 = smov 512   ;;  %s2608_s21 = smov 32  }
  0x23   :  { %27 = dma.hbm_to_vmem [thread:$0]  %s2782_s1, 17920, %s22_s12, [#allocation3], %s2607_s2, %s2607_s2, %s2608_s21  }
  0x24   :  { %s2609_s24 = smov [#allocation6]   ;;  %s2553_s28 = scalar_lea.hbm %s2784_s3, 2048 }
  0x25   :  { %s45_s25 = sshll.u32 %s2609_s24, 4  ;;  %p2554_p2 = scmp.ne.s32.totalorder %s2784_s3, %s2553_s28  ;;  %s46_s25 = int_to_ptr.vmem [resolvable:$true] %s45_s25 }
  0x26   :  { %p2557_p3 = scmp.lt.u32.totalorder %s2553_s28, %s2784_s3 }
  0x28   :  { %p2559_p4 = pnand %p2557_p3, %p2554_p2 }
  0x2a   :  { %2562 = shalt.err (!%p2559_p4)
}
  0x2b   :  { %s2563_s9 = scalar_lea.vmem %s46_s25, 2048  ;;  %p2568_p6 = scmp.lt.s32.totalorder %s46_s25, %s46_s25 }
  0x2c   :  { %p2564_p5 = scmp.ne.s32.totalorder %s46_s25, %s2563_s9  ;;  %p2569_p7 = scmp.lt.s32.totalorder %s2563_s9, %s2563_s9 }
  0x2e   :  { %p2570_p8 = por %p2569_p7, %p2568_p6 }
  0x30   :  { %p2571_p9 = pnand %p2570_p8, %p2564_p5 }
  0x32   :  { %2574 = shalt.err (!%p2571_p9)
}
  0x33   :  { %s2610_s1 = smov 128   ;;  %s2611_s10 = smov 8  }
  0x34   :  { %51 = dma.hbm_to_vmem [thread:$0]  %s2784_s3, 2048, %s46_s25, [#allocation5], %s2610_s1, %s2610_s1, %s2611_s10  }
  0x35   :  { %s2612_s13 = smov [#allocation7]   ;;  %s2575_s17 = scalar_lea.hbm %s2785_s4, 4096 }
  0x36   :  { %s57_s14 = sshll.u32 %s2612_s13, 4  ;;  %p2576_p10 = scmp.ne.s32.totalorder %s2785_s4, %s2575_s17  ;;  %s58_s14 = int_to_ptr.vmem [resolvable:$true] %s57_s14 }
  0x37   :  { %p2579_p11 = scmp.lt.u32.totalorder %s2575_s17, %s2785_s4 }
  0x39   :  { %p2581_p12 = pnand %p2579_p11, %p2576_p10 }
  0x3b   :  { %2584 = shalt.err (!%p2581_p12)
}
  0x3c   :  { %s2585_s21 = scalar_lea.vmem %s58_s14, 4096  ;;  %p2590_p0 = scmp.lt.s32.totalorder %s58_s14, %s58_s14 }
  0x3d   :  { %p2586_p13 = scmp.ne.s32.totalorder %s58_s14, %s2585_s21  ;;  %p2591_p1 = scmp.lt.s32.totalorder %s2585_s21, %s2585_s21 }
  0x3f   :  { %p2592_p2 = por %p2591_p1, %p2590_p0 }
  0x41   :  { %p2593_p3 = pnand %p2592_p2, %p2586_p13 }
  0x43   :  { %2596 = shalt.err (!%p2593_p3)
}
  0x44   :  { %63 = dma.hbm_to_vmem [thread:$0]  %s2785_s4, 4096, %s58_s14, [#allocation8], %s2610_s1, %s2610_s1, %s2611_s10  }
  0x45   :  { %2597 = dma.done.wait [#allocation3], 17920  }
  0x46   :  { %2598 = vsyncadd [#allocation3], 4294949376 }
  0x47   :  { %2599 = dma.done.wait [#allocation5], 6144  }
  0x48   :  { %2600 = vsyncadd [#allocation5], 4294961152 }
  0x49   :  { %2601 = dma.done.wait [#allocation8], 4096  }
  0x4a   :  { %2602 = vsyncadd [#allocation8], 4294963200  ;;  %v85_v0 = vld [vmem:[#allocation2] sm:$0xff]  ;;  %v86_v9 = vld [vmem:[#allocation2 + $0x8] sm:$0xff]  ;;  %vm971_vm0 = vcmask 1040384   ;;  %vm967_vm1 = vcmask 146432  }
  0x4b   :  { %v89_v1 = vld [vmem:[#allocation2 + $0x20] sm:$0xff]  ;;  %v90_v10 = vld [vmem:[#allocation2 + $0x28] sm:$0xff] }
  0x4c   :  { %v93_v2 = vld [vmem:[#allocation2 + $0x40] sm:$0xff]  ;;  %v2090_v3 = vcombine.high %v85_v0, %v89_v1  ;;  %v2089_v4 = vcombine.low %v85_v0, %v89_v1  ;;  %v2092_v12 = vcombine.high %v86_v9, %v90_v10  ;;  %v2091_v13 = vcombine.low %v86_v9, %v90_v10  ;;  %v94_v14 = vld [vmem:[#allocation2 + $0x48] sm:$0xff] }
  0x4d   :  { %v97_v5 = vld [vmem:[#allocation2 + $0x60] sm:$0xff]  ;;  %v98_v17 = vld [vmem:[#allocation2 + $0x68] sm:$0xff] }
  0x4e   :  { %v2098_v6 = vcombine.high %v93_v2, %v97_v5  ;;  %v101_v7 = vld [vmem:[#allocation2 + $0x80] sm:$0xff]  ;;  %996 = vmatprep.subr.bf16.mxu0 %v2090_v3  ;;  %v2097_v11 = vcombine.low %v93_v2, %v97_v5  ;;  %1078 = vmatprep.subr.bf16.mxu1 %v2092_v12  ;;  %v2100_v19 = vcombine.high %v94_v14, %v98_v17  ;;  %v102_v20 = vld [vmem:[#allocation2 + $0x88] sm:$0xff] }
  0x4f   :  { %v105_v8 = vld [vmem:[#allocation2 + $0xa0] sm:$0xff]  ;;  %997 = vmatpush1.bf16.msra.mxu0 %v2089_v4  ;;  %v106_v21 = vld [vmem:[#allocation2 + $0xa8] sm:$0xff]  ;;  %1079 = vmatpush1.bf16.msra.mxu1 %v2091_v13  ;;  %v2099_v22 = vcombine.low %v94_v14, %v98_v17 }
  0x50   :  { %998 = vmatprep.subr.bf16.mxu0 %v2098_v6  ;;  %v2106_v15 = vcombine.high %v101_v7, %v105_v8  ;;  %v109_v16 = vld [vmem:[#allocation2 + $0xc0] sm:$0xff]  ;;  %v2105_v23 = vcombine.low %v101_v7, %v105_v8  ;;  %1080 = vmatprep.subr.bf16.mxu1 %v2100_v19  ;;  %v2108_v24 = vcombine.high %v102_v20, %v106_v21  ;;  %v110_v26 = vld [vmem:[#allocation2 + $0xc8] sm:$0xff] }
  0x51   :  { %v113_v18 = vld [vmem:[#allocation2 + $0xe0] sm:$0xff]  ;;  %v114_v27 = vld [vmem:[#allocation2 + $0xe8] sm:$0xff]  ;;  %v2107_v30 = vcombine.low %v102_v20, %v106_v21 }
  0x52   :  { %v2114_v25 = vcombine.high %v109_v16, %v113_v18  ;;  %v117_v28 = vld [vmem:[#allocation2 + $0x100] sm:$0xff]  ;;  %v2113_v31 = vcombine.low %v109_v16, %v113_v18  ;;  %v2116_v32 = vcombine.high %v110_v26, %v114_v27  ;;  %v118_v34 = vld [vmem:[#allocation2 + $0x108] sm:$0xff]  ;;  %v2115_v38 = vcombine.low %v110_v26, %v114_v27 }
  0x53   :  { %999 = vmatpush1.bf16.msra.mxu0 %v2097_v11  ;;  %v121_v29 = vld [vmem:[#allocation2 + $0x120] sm:$0xff]  ;;  %1081 = vmatpush1.bf16.msra.mxu1 %v2099_v22  ;;  %v122_v35 = vld [vmem:[#allocation2 + $0x128] sm:$0xff] }
  0x54   :  { %1000 = vmatprep.subr.bf16.mxu0 %v2106_v15  ;;  %1082 = vmatprep.subr.bf16.mxu1 %v2108_v24  ;;  %v2122_v33 = vcombine.high %v117_v28, %v121_v29  ;;  %v125_v36 = vld [vmem:[#allocation2 + $0x140] sm:$0xff]  ;;  %v2121_v39 = vcombine.low %v117_v28, %v121_v29  ;;  %v2124_v40 = vcombine.high %v118_v34, %v122_v35  ;;  %v126_v42 = vld [vmem:[#allocation2 + $0x148] sm:$0xff] }
  0x55   :  { %v129_v37 = vld [vmem:[#allocation2 + $0x160] sm:$0xff]  ;;  %v130_v43 = vld [vmem:[#allocation2 + $0x168] sm:$0xff]  ;;  %v2123_v47 = vcombine.low %v118_v34, %v122_v35 }
  0x56   :  { %v2130_v41 = vcombine.high %v125_v36, %v129_v37  ;;  %v133_v44 = vld [vmem:[#allocation2 + $0x180] sm:$0xff]  ;;  %v80_v46 = vld [vmem:[%s2781_s0 + $0x8] sm:$0xff]  ;;  %v2129_v49 = vcombine.low %v125_v36, %v129_v37  ;;  %v2132_v50 = vcombine.high %v126_v42, %v130_v43  ;;  %v2131_v56 = vcombine.low %v126_v42, %v130_v43 }
  0x57   :  { %1001 = vmatpush1.bf16.msra.mxu0 %v2105_v23  ;;  %1083 = vmatpush1.bf16.msra.mxu1 %v2107_v30  ;;  %v137_v45 = vld [vmem:[#allocation2 + $0x1a0] sm:$0xff]  ;;  %v2700_v48 = vpack.c.bf16 %v80_v46, %v80_v46  ;;  %v134_v52 = vld [vmem:[#allocation2 + $0x188] sm:$0xff] }
  0x58   :  { %1002 = vmatprep.subr.bf16.mxu0 %v2114_v25  ;;  %1084 = vmatprep.subr.bf16.mxu1 %v2116_v32  ;;  %v2138_v51 = vcombine.high %v133_v44, %v137_v45  ;;  %v138_v53 = vld [vmem:[#allocation2 + $0x1a8] sm:$0xff]  ;;  %v141_v54 = vld [vmem:[#allocation2 + $0x1c0] sm:$0xff]  ;;  %v2137_v57 = vcombine.low %v133_v44, %v137_v45 }
  0x59   :  { %1028 = vmatprep.mubr.bf16.mxu0 %v2700_v48  ;;  %v145_v55 = vld [vmem:[#allocation2 + $0x1e0] sm:$0xff]  ;;  %1110 = vmatprep.mubr.bf16.mxu1 %v2700_v48  ;;  %v2140_v58 = vcombine.high %v134_v52, %v138_v53  ;;  %v142_v60 = vld [vmem:[#allocation2 + $0x1c8] sm:$0xff]  ;;  %v2139_v0 = vcombine.low %v134_v52, %v138_v53 }
  0x5a   :  { %v2146_v59 = vcombine.high %v141_v54, %v145_v55  ;;  %v146_v61 = vld [vmem:[#allocation2 + $0x1e8] sm:$0xff]  ;;  %v149_v62 = vld [vmem:[#allocation2 + $0x200] sm:$0xff]  ;;  %v2145_v1 = vcombine.low %v141_v54, %v145_v55 }
  0x5b   :  { %1003 = vmatpush1.bf16.msra.mxu0 %v2113_v31  ;;  %1085 = vmatpush1.bf16.msra.mxu1 %v2115_v38  ;;  %v153_v63 = vld [vmem:[#allocation2 + $0x220] sm:$0xff]  ;;  %v2148_v2 = vcombine.high %v142_v60, %v146_v61  ;;  %v150_v4 = vld [vmem:[#allocation2 + $0x208] sm:$0xff]  ;;  %v2147_v8 = vcombine.low %v142_v60, %v146_v61 }
  0x5c   :  { %1004 = vmatprep.subr.bf16.mxu0 %v2122_v33  ;;  %1086 = vmatprep.subr.bf16.mxu1 %v2124_v40  ;;  %v2154_v3 = vcombine.high %v149_v62, %v153_v63  ;;  %v154_v5 = vld [vmem:[#allocation2 + $0x228] sm:$0xff]  ;;  %v157_v6 = vld [vmem:[#allocation2 + $0x240] sm:$0xff]  ;;  %v2153_v9 = vcombine.low %v149_v62, %v153_v63 }
  0x5d   :  { %v161_v7 = vld [vmem:[#allocation2 + $0x260] sm:$0xff]  ;;  %v2156_v10 = vcombine.high %v150_v4, %v154_v5  ;;  %v158_v12 = vld [vmem:[#allocation2 + $0x248] sm:$0xff]  ;;  %v2155_v16 = vcombine.low %v150_v4, %v154_v5 }
  0x5e   :  { %v2162_v11 = vcombine.high %v157_v6, %v161_v7  ;;  %v162_v13 = vld [vmem:[#allocation2 + $0x268] sm:$0xff]  ;;  %v165_v14 = vld [vmem:[#allocation2 + $0x280] sm:$0xff]  ;;  %v2161_v17 = vcombine.low %v157_v6, %v161_v7 }
  0x5f   :  { %1005 = vmatpush1.bf16.msra.mxu0 %v2121_v39  ;;  %1087 = vmatpush1.bf16.msra.mxu1 %v2123_v47  ;;  %v169_v15 = vld [vmem:[#allocation2 + $0x2a0] sm:$0xff]  ;;  %v2164_v18 = vcombine.high %v158_v12, %v162_v13  ;;  %v166_v20 = vld [vmem:[#allocation2 + $0x288] sm:$0xff]  ;;  %v2163_v24 = vcombine.low %v158_v12, %v162_v13  ;;  %v96_v13 = vld [vmem:[#allocation2 + $0x58] sm:$0xff] }
  0x60   :  { %1006 = vmatprep.subr.bf16.mxu0 %v2130_v41  ;;  %1088 = vmatprep.subr.bf16.mxu1 %v2132_v50  ;;  %v2170_v19 = vcombine.high %v165_v14, %v169_v15  ;;  %v170_v21 = vld [vmem:[#allocation2 + $0x2a8] sm:$0xff]  ;;  %v173_v22 = vld [vmem:[#allocation2 + $0x2c0] sm:$0xff]  ;;  %v2169_v25 = vcombine.low %v165_v14, %v169_v15  ;;  %v100_v14 = vld [vmem:[#allocation2 + $0x78] sm:$0xff] }
  0x61   :  { %v177_v23 = vld [vmem:[#allocation2 + $0x2e0] sm:$0xff]  ;;  %v2172_v26 = vcombine.high %v166_v20, %v170_v21  ;;  %v174_v28 = vld [vmem:[#allocation2 + $0x2c8] sm:$0xff]  ;;  %v2171_v32 = vcombine.low %v166_v20, %v170_v21  ;;  %v104_v21 = vld [vmem:[#allocation2 + $0x98] sm:$0xff] }
  0x62   :  { %v2178_v27 = vcombine.high %v173_v22, %v177_v23  ;;  %v178_v29 = vld [vmem:[#allocation2 + $0x2e8] sm:$0xff]  ;;  %v181_v30 = vld [vmem:[#allocation2 + $0x300] sm:$0xff]  ;;  %v2177_v33 = vcombine.low %v173_v22, %v177_v23  ;;  %v108_v22 = vld [vmem:[#allocation2 + $0xb8] sm:$0xff]  ;;  %v2613_v23 = vmov 0  }
  0x63   :  { %1007 = vmatpush1.bf16.msra.mxu0 %v2129_v49  ;;  %1089 = vmatpush1.bf16.msra.mxu1 %v2131_v56  ;;  %v185_v31 = vld [vmem:[#allocation2 + $0x320] sm:$0xff]  ;;  %v2180_v34 = vcombine.high %v174_v28, %v178_v29  ;;  %v182_v37 = vld [vmem:[#allocation2 + $0x308] sm:$0xff]  ;;  %v2179_v41 = vcombine.low %v174_v28, %v178_v29  ;;  %v2112_v29 = vcombine.high %v104_v21, %v108_v22 }
  0x64   :  { %1008 = vmatprep.subr.bf16.mxu0 %v2138_v51  ;;  %1090 = vmatprep.subr.bf16.mxu1 %v2140_v58  ;;  %v2704_v35 = vld [vmem:[#allocation2 + $0x440] sm:$0x11]  ;;  %v2186_v36 = vcombine.high %v181_v30, %v185_v31  ;;  %v186_v38 = vld [vmem:[#allocation2 + $0x328] sm:$0xff]  ;;  %v2185_v45 = vcombine.low %v181_v30, %v185_v31  ;;  %v112_v30 = vld [vmem:[#allocation2 + $0xd8] sm:$0xff] }
  0x65   :  { %v189_v39 = vld [vmem:[#allocation2 + $0x340] sm:$0xff]  ;;  %v190_v42 = vld [vmem:[#allocation2 + $0x348] sm:$0xff]  ;;  %v2225_v44 = vcombine.low %v2704_v35, %v2704_v35  ;;  %v2188_v49 = vcombine.high %v182_v37, %v186_v38  ;;  %v2187_v51 = vcombine.low %v182_v37, %v186_v38  ;;  %v116_v31 = vld [vmem:[#allocation2 + $0xf8] sm:$0xff] }
  0x66   :  { %v193_v40 = vld [vmem:[#allocation2 + $0x360] sm:$0xff]  ;;  %v194_v43 = vld [vmem:[#allocation2 + $0x368] sm:$0xff]  ;;  %v87_v37 = vld [vmem:[#allocation2 + $0x10] sm:$0xff] }
  0x67   :  { %1009 = vmatpush1.bf16.msra.mxu0 %v2137_v57  ;;  %1091 = vmatpush1.bf16.msra.mxu1 %v2139_v0  ;;  %v197_v46 = vld [vmem:[#allocation2 + $0x380] sm:$0xff]  ;;  %v2194_v50 = vcombine.high %v189_v39, %v193_v40  ;;  %v2709_v52 = vsel %vm971_vm0, %v2225_v44, 0  ;;  %v198_v53 = vld [vmem:[#allocation2 + $0x388] sm:$0xff]  ;;  %v2193_v55 = vcombine.low %v189_v39, %v193_v40  ;;  %v2196_v58 = vcombine.high %v190_v42, %v194_v43  ;;  %v91_v38 = vld [vmem:[#allocation2 + $0x30] sm:$0xff] }
  0x68   :  { %1010 = vmatprep.subr.bf16.mxu0 %v2146_v59  ;;  %1092 = vmatprep.subr.bf16.mxu1 %v2148_v2  ;;  %v201_v47 = vld [vmem:[#allocation2 + $0x3a0] sm:$0xff]  ;;  %v202_v54 = vld [vmem:[#allocation2 + $0x3a8] sm:$0xff]  ;;  %v2195_v60 = vcombine.low %v190_v42, %v194_v43  ;;  %v2119_v42 = vcombine.low %v112_v30, %v116_v31  ;;  %v128_v43 = vld [vmem:[#allocation2 + $0x158] sm:$0xff] }
  0x69   :  { %v205_v56 = vld [vmem:[#allocation2 + $0x3c0] sm:$0xff]  ;;  %v2202_v59 = vcombine.high %v197_v46, %v201_v47  ;;  %v206_v61 = vld [vmem:[#allocation2 + $0x3c8] sm:$0xff]  ;;  %v2201_v63 = vcombine.low %v197_v46, %v201_v47  ;;  %v2204_v2 = vcombine.high %v198_v53, %v202_v54  ;;  %v2203_v5 = vcombine.low %v198_v53, %v202_v54  ;;  %v132_v44 = vld [vmem:[#allocation2 + $0x178] sm:$0xff] }
  0x6a   :  { %v209_v57 = vld [vmem:[#allocation2 + $0x3e0] sm:$0xff]  ;;  %v210_v62 = vld [vmem:[#allocation2 + $0x3e8] sm:$0xff]  ;;  %v99_v46 = vld [vmem:[#allocation2 + $0x70] sm:$0xff]  ;;  %v2136_v53 = vcombine.high %v128_v43, %v132_v44 }
  0x6b   :  { %1011 = vmatpush1.bf16.msra.mxu0 %v2145_v1  ;;  %1093 = vmatpush1.bf16.msra.mxu1 %v2147_v8  ;;  %v213_v0 = vld [vmem:[#allocation2 + $0x400] sm:$0xff]  ;;  %v2209_v6 = vcombine.low %v205_v56, %v209_v57  ;;  %v2212_v7 = vcombine.high %v206_v61, %v210_v62  ;;  %v88_v8 = vld [vmem:[#allocation2 + $0x18] sm:$0xff]  ;;  %v2211_v12 = vcombine.low %v206_v61, %v210_v62  ;;  %v222_v28 = vld [vmem:[#allocation2 + $0x448] sm:$0x11] }
  0x6c   :  { %1012 = vmatprep.subr.bf16.mxu0 %v2154_v3  ;;  %1094 = vmatprep.subr.bf16.mxu1 %v2156_v10  ;;  %v217_v1 = vld [vmem:[#allocation2 + $0x420] sm:$0xff]  ;;  %v2210_v3 = vcombine.high %v205_v56, %v209_v57  ;;  %v2228_v39 = vcombine.high %v222_v28, %v222_v28  ;;  %v2227_v40 = vcombine.low %v222_v28, %v222_v28  ;;  %v140_v56 = vld [vmem:[#allocation2 + $0x1b8] sm:$0xff]  ;;  %v103_v57 = vld [vmem:[#allocation2 + $0x90] sm:$0xff] }
  0x6d   :  { %v79_v4 = vld [vmem:[%s2781_s0] sm:$0xff]  ;;  %v2218_v10 = vcombine.high %v213_v0, %v217_v1  ;;  %v2217_v15 = vcombine.low %v213_v0, %v217_v1  ;;  %v148_v0 = vld [vmem:[#allocation2 + $0x1f8] sm:$0xff]  ;;  %v111_v1 = vld [vmem:[#allocation2 + $0xd0] sm:$0xff] }
  0x6f   :  { %1013 = vmatpush1.bf16.msra.mxu0 %v2153_v9  ;;  %1095 = vmatpush1.bf16.msra.mxu1 %v2155_v16  ;;  %v92_v9 = vld [vmem:[#allocation2 + $0x38] sm:$0xff]  ;;  %v214_v16 = vld [vmem:[#allocation2 + $0x408] sm:$0xff] }
  0x70   :  { %1014 = vmatprep.subr.bf16.mxu0 %v2162_v11  ;;  %1096 = vmatprep.subr.bf16.mxu1 %v2164_v18  ;;  %v2714_v11 = vpack.c.bf16 %v79_v4, %v79_v4  ;;  %v2226_v18 = vcombine.high %v2704_v35, %v2704_v35  ;;  %v2095_v20 = vcombine.low %v88_v8, %v92_v9  ;;  %v124_v35 = vld [vmem:[#allocation2 + $0x138] sm:$0xff] }
  0x73   :  { %1015 = vmatpush1.bf16.msra.mxu0 %v2161_v17  ;;  %1097 = vmatpush1.bf16.msra.mxu1 %v2163_v24  ;;  %v218_v17 = vld [vmem:[#allocation2 + $0x428] sm:$0xff]  ;;  %v2104_v24 = vcombine.high %v96_v13, %v100_v14 }
  0x74   :  { %1016 = vmatprep.subr.bf16.mxu0 %v2170_v19  ;;  %1098 = vmatprep.subr.bf16.mxu1 %v2172_v26  ;;  %v2096_v19 = vcombine.high %v88_v8, %v92_v9  ;;  %v81_v26 = vld [vmem:[%s2781_s0 + $0x10] sm:$0xff]  ;;  %v156_v8 = vld [vmem:[#allocation2 + $0x238] sm:$0xff] }
  0x75   :  { %v119_v9 = vld [vmem:[#allocation2 + $0x110] sm:$0xff] }
  0x77   :  { %1017 = vmatpush1.bf16.msra.mxu0 %v2169_v25  ;;  %1099 = vmatpush1.bf16.msra.mxu1 %v2171_v32  ;;  %v2220_v25 = vcombine.high %v214_v16, %v218_v17  ;;  %v2727_v32 = vpack.c.bf16 %v81_v26, %v81_v26  ;;  %v135_v26 = vld [vmem:[#allocation2 + $0x190] sm:$0xff] }
  0x78   :  { %1018 = vmatprep.subr.bf16.mxu0 %v2178_v27  ;;  %1100 = vmatprep.subr.bf16.mxu1 %v2180_v34  ;;  %v2103_v27 = vcombine.low %v96_v13, %v100_v14  ;;  %v120_v34 = vld [vmem:[#allocation2 + $0x118] sm:$0xff] }
  0x79   :  { %v2128_v47 = vcombine.high %v120_v34, %v124_v35 }
  0x7b   :  { %1019 = vmatpush1.bf16.msra.mxu0 %v2177_v33  ;;  %1101 = vmatpush1.bf16.msra.mxu1 %v2179_v41  ;;  %v2111_v33 = vcombine.low %v104_v21, %v108_v22  ;;  %v2120_v41 = vcombine.high %v112_v30, %v116_v31 }
  0x7c   :  { %1020 = vmatprep.subr.bf16.mxu0 %v2186_v36  ;;  %1102 = vmatprep.subr.bf16.mxu1 %v2188_v49  ;;  %v2219_v36 = vcombine.low %v214_v16, %v218_v17  ;;  %v979_v49 = vsel %vm971_vm0, %v2227_v40, 0  ;;  %v164_v16 = vld [vmem:[#allocation2 + $0x278] sm:$0xff]  ;;  %v127_v17 = vld [vmem:[#allocation2 + $0x150] sm:$0xff] }
  0x7f   :  { %1021 = vmatpush1.bf16.msra.mxu0 %v2185_v45  ;;  %1103 = vmatpush1.bf16.msra.mxu1 %v2187_v51  ;;  %v95_v45 = vld [vmem:[#allocation2 + $0x50] sm:$0xff]  ;;  %v2127_v51 = vcombine.low %v120_v34, %v124_v35  ;;  %v180_v34 = vld [vmem:[#allocation2 + $0x2f8] sm:$0xff] }
  0x80   :  { %1022 = vmatprep.subr.bf16.mxu0 %v2194_v50  ;;  %1104 = vmatprep.subr.bf16.mxu1 %v2196_v58  ;;  %v2094_v50 = vcombine.high %v87_v37, %v91_v38  ;;  %v2102_v54 = vcombine.high %v95_v45, %v99_v46  ;;  %v107_v58 = vld [vmem:[#allocation2 + $0xb0] sm:$0xff] }
  0x81   :  { %v2110_v62 = vcombine.high %v103_v57, %v107_v58  ;;  %v2109_v4 = vcombine.low %v103_v57, %v107_v58  ;;  %v143_v35 = vld [vmem:[#allocation2 + $0x1d0] sm:$0xff]  ;;  %v200_v58 = vld [vmem:[#allocation2 + $0x398] sm:$0xff] }
  0x83   :  { %1023 = vmatpush1.bf16.msra.mxu0 %v2193_v55  ;;  %1105 = vmatpush1.bf16.msra.mxu1 %v2195_v60  ;;  %v136_v55 = vld [vmem:[#allocation2 + $0x198] sm:$0xff]  ;;  %v2101_v60 = vcombine.low %v95_v45, %v99_v46 }
  0x84   :  { %1024 = vmatprep.subr.bf16.mxu0 %v2202_v59  ;;  %1106 = vmatprep.subr.bf16.mxu1 %v2204_v2  ;;  %v2135_v59 = vcombine.low %v128_v43, %v132_v44  ;;  %v2144_v61 = vcombine.high %v136_v55, %v140_v56  ;;  %v115_v2 = vld [vmem:[#allocation2 + $0xf0] sm:$0xff] }
  0x85   :  { %v2117_v13 = vcombine.low %v111_v1, %v115_v2  ;;  %v151_v43 = vld [vmem:[#allocation2 + $0x210] sm:$0xff] }
  0x86   :  { %v155_v44 = vld [vmem:[#allocation2 + $0x230] sm:$0xff] }
  0x87   :  { %1025 = vmatpush1.bf16.msra.mxu0 %v2201_v63  ;;  %1107 = vmatpush1.bf16.msra.mxu1 %v2203_v5  ;;  %v144_v63 = vld [vmem:[#allocation2 + $0x1d8] sm:$0xff] }
  0x88   :  { %1026 = vmatprep.subr.bf16.mxu0 %v2210_v3  ;;  %1108 = vmatprep.subr.bf16.mxu1 %v2212_v7  ;;  %v2143_v3 = vcombine.low %v136_v55, %v140_v56  ;;  %v2152_v5 = vcombine.high %v144_v63, %v148_v0  ;;  %v152_v7 = vld [vmem:[#allocation2 + $0x218] sm:$0xff]  ;;  %v2157_v55 = vcombine.low %v151_v43, %v155_v44 }
  0x8b   :  { %1027 = vmatpush1.bf16.msra.mxu0 %v2209_v6  ;;  %1109 = vmatpush1.bf16.msra.mxu1 %v2211_v12  ;;  %v2118_v6 = vcombine.high %v111_v1, %v115_v2  ;;  %v2151_v12 = vcombine.low %v144_v63, %v148_v0  ;;  %v208_v2 = vld [vmem:[#allocation2 + $0x3d8] sm:$0xff] }
  0x8c   :  { %1037 = vmatprep.subr.bf16.mxu0 %v2218_v10  ;;  %1242 = vmatprep.subr.bf16.mxu1 %v2096_v19  ;;  %v123_v10 = vld [vmem:[#allocation2 + $0x130] sm:$0xff]  ;;  %v2159_v19 = vcombine.low %v152_v7, %v156_v8 }
  0x8d   :  { %v2126_v14 = vcombine.high %v119_v9, %v123_v10 }
  0x8e   :  { %1029 = vmatmul.mubr.bf16.vlgmr.msra.gmra.mrb[0].mxu0 %v2714_v11  ;;  %1111 = vmatmul.mubr.bf16.vlgmr.msra.gmra.mrb[0].mxu1 %v2714_v11 }
  0x8f   :  { %1038 = vmatpush1.bf16.msra.mxu0 %v2217_v15  ;;  %1069 = vmatprep.mubr.bf16.mxu0 %v2613_v23  ;;  %v160_v15 = vld [vmem:[#allocation2 + $0x258] sm:$0xff] }
  0x90   :  { %2233 = vmatprep.subr.msk.bf16.mxu0 %vm971_vm0, %v2226_v18  ;;  %1243 = vmatpush1.bf16.msra.mxu1 %v2095_v20  ;;  %v131_v18 = vld [vmem:[#allocation2 + $0x170] sm:$0xff]  ;;  %v2125_v20 = vcombine.low %v119_v9, %v123_v10  ;;  %v2168_v21 = vcombine.high %v160_v15, %v164_v16  ;;  %v2167_v28 = vcombine.low %v160_v15, %v164_v16 }
  0x91   :  { %1274 = vmatprep.mubr.bf16.mxu1 %v2700_v48  ;;  %1244 = vmatprep.subr.bf16.mxu1 %v2104_v24  ;;  %v2134_v22 = vcombine.high %v127_v17, %v131_v18  ;;  %v168_v24 = vld [vmem:[#allocation2 + $0x298] sm:$0xff]  ;;  %v183_v10 = vld [vmem:[#allocation2 + $0x310] sm:$0xff] }
  0x92   :  { %v191_v15 = vld [vmem:[#allocation2 + $0x350] sm:$0xff] }
  0x93   :  { %1040 = vmatpush1.bf16.msra.mxu0 %v2709_v52  ;;  %v2093_v52 = vcombine.low %v87_v37, %v91_v38  ;;  %v195_v16 = vld [vmem:[#allocation2 + $0x370] sm:$0xff] }
  0x94   :  { %1119 = vmatprep.subr.bf16.mxu0 %v2220_v25  ;;  %1245 = vmatpush1.bf16.msra.mxu1 %v2103_v27  ;;  %v172_v25 = vld [vmem:[#allocation2 + $0x2b8] sm:$0xff]  ;;  %v139_v27 = vld [vmem:[#allocation2 + $0x1b0] sm:$0xff] }
  0x95   :  { %1246 = vmatprep.subr.bf16.mxu1 %v2112_v29  ;;  %v2133_v29 = vcombine.low %v127_v17, %v131_v18  ;;  %v2176_v30 = vcombine.high %v168_v24, %v172_v25  ;;  %v2142_v31 = vcombine.high %v135_v26, %v139_v27  ;;  %v2175_v37 = vcombine.low %v168_v24, %v172_v25  ;;  %v207_v24 = vld [vmem:[#allocation2 + $0x3d0] sm:$0xff] }
  0x96   :  { %v2141_v38 = vcombine.low %v135_v26, %v139_v27  ;;  %v2198_v18 = vcombine.high %v191_v15, %v195_v16  ;;  %v211_v25 = vld [vmem:[#allocation2 + $0x3f0] sm:$0xff] }
  0x97   :  { %v2214_v27 = vcombine.high %v207_v24, %v211_v25 }
  0x98   :  { %1247 = vmatpush1.bf16.msra.mxu1 %v2111_v33  ;;  %v176_v33 = vld [vmem:[#allocation2 + $0x2d8] sm:$0xff] }
  0x99   :  { %1248 = vmatprep.subr.bf16.mxu1 %v2120_v41  ;;  %v184_v41 = vld [vmem:[#allocation2 + $0x318] sm:$0xff]  ;;  %v2183_v45 = vcombine.low %v176_v33, %v180_v34 }
  0x9a   :  { %2234 = vmatmul.mubr.msk.bf16.vlgmr.msra.gmra.mrb[0].mxu0 %vm967_vm1, %v2727_v32 }
  0x9b   :  { %1120 = vmatpush1.bf16.msra.mxu0 %v2219_v36  ;;  %1151 = vmatprep.mubr.bf16.mxu0 %v2613_v23  ;;  %v147_v36 = vld [vmem:[#allocation2 + $0x1f0] sm:$0xff] }
  0x9c   :  { %2235 = vmatprep.subr.msk.bf16.mxu0 %vm971_vm0, %v2228_v39  ;;  %1249 = vmatpush1.bf16.msra.mxu1 %v2119_v42  ;;  %v2184_v39 = vcombine.high %v176_v33, %v180_v34  ;;  %v2150_v40 = vcombine.high %v143_v35, %v147_v36  ;;  %v188_v42 = vld [vmem:[#allocation2 + $0x338] sm:$0xff]  ;;  %v2149_v46 = vcombine.low %v143_v35, %v147_v36  ;;  %v223_v33 = vld [vmem:[#allocation2 + $0x450] sm:$0x11] }
  0x9d   :  { %1250 = vmatprep.subr.bf16.mxu1 %v2128_v47  ;;  %v2192_v47 = vcombine.high %v184_v41, %v188_v42  ;;  %v2230_v35 = vcombine.high %v223_v33, %v223_v33  ;;  %v2229_v36 = vcombine.low %v223_v33, %v223_v33 }
  0x9f   :  { %1122 = vmatpush1.bf16.msra.mxu0 %v979_v49  ;;  %v2158_v49 = vcombine.high %v151_v43, %v155_v44 }
  0xa0   :  { %1160 = vmatprep.subr.bf16.mxu0 %v2094_v50  ;;  %1251 = vmatpush1.bf16.msra.mxu1 %v2127_v51  ;;  %v192_v50 = vld [vmem:[#allocation2 + $0x358] sm:$0xff] }
  0xa1   :  { %1252 = vmatprep.subr.bf16.mxu1 %v2136_v53  ;;  %v196_v51 = vld [vmem:[#allocation2 + $0x378] sm:$0xff]  ;;  %v163_v53 = vld [vmem:[#allocation2 + $0x270] sm:$0xff] }
  0xa2   :  { %2236 = vmatmul.mubr.msk.bf16.vlgmr.msra.gmra.mrb[4].mxu0 %vm967_vm1, %v2727_v32  ;;  %v2200_v56 = vcombine.high %v192_v50, %v196_v51 }
  0xa3   :  { %1161 = vmatpush1.bf16.msra.mxu0 %v2093_v52  ;;  %1192 = vmatprep.mubr.bf16.mxu0 %v2700_v48  ;;  %v2160_v48 = vcombine.high %v152_v7, %v156_v8  ;;  %v159_v52 = vld [vmem:[#allocation2 + $0x250] sm:$0xff] }
  0xa4   :  { %1162 = vmatprep.subr.bf16.mxu0 %v2102_v54  ;;  %1253 = vmatpush1.bf16.msra.mxu1 %v2135_v59  ;;  %v2191_v54 = vcombine.low %v184_v41, %v188_v42  ;;  %v2166_v57 = vcombine.high %v159_v52, %v163_v53  ;;  %v204_v59 = vld [vmem:[#allocation2 + $0x3b8] sm:$0xff]  ;;  %v2165_v63 = vcombine.low %v159_v52, %v163_v53  ;;  %v2414_v52 = vld [vmem:[#allocation4 + $0xc8] sm:$0xff]   ;;  %v2409_v53 = vld [vmem:[#allocation4 + $0x50] sm:$0xff]  }
  0xa5   :  { %1254 = vmatprep.subr.bf16.mxu1 %v2144_v61  ;;  %v171_v61 = vld [vmem:[#allocation2 + $0x2b0] sm:$0xff]  ;;  %v2208_v0 = vcombine.high %v200_v58, %v204_v59  ;;  %v224_v41 = vld [vmem:[#allocation2 + $0x458] sm:$0x11] }
  0xa6   :  { %v2232_v43 = vcombine.high %v224_v41, %v224_v41  ;;  %v2231_v44 = vcombine.low %v224_v41, %v224_v41 }
  0xa7   :  { %1163 = vmatpush1.bf16.msra.mxu0 %v2101_v60  ;;  %v167_v60 = vld [vmem:[#allocation2 + $0x290] sm:$0xff] }
  0xa8   :  { %1164 = vmatprep.subr.bf16.mxu0 %v2110_v62  ;;  %1255 = vmatpush1.bf16.msra.mxu1 %v2143_v3  ;;  %v2199_v62 = vcombine.low %v192_v50, %v196_v51  ;;  %v2174_v1 = vcombine.high %v167_v60, %v171_v61  ;;  %v212_v3 = vld [vmem:[#allocation2 + $0x3f8] sm:$0xff]  ;;  %v2173_v7 = vcombine.low %v167_v60, %v171_v61  ;;  %v2412_v50 = vld [vmem:[#allocation4 + $0x80] sm:$0xff]   ;;  %v2408_v51 = vld [vmem:[#allocation4 + $0x8] sm:$0xff]  }
  0xa9   :  { %1256 = vmatprep.subr.bf16.mxu1 %v2152_v5  ;;  %v179_v5 = vld [vmem:[#allocation2 + $0x2f0] sm:$0xff]  ;;  %v2216_v8 = vcombine.high %v208_v2, %v212_v3  ;;  %v2417_v60 = vld [vmem:[#allocation4 + $0x60] sm:$0xff]  }
  0xaa   :  { %v2419_v61 = vld [vmem:[#allocation4 + $0x20] sm:$0xff]  }
  0xab   :  { %1165 = vmatpush1.bf16.msra.mxu0 %v2109_v4  ;;  %v175_v4 = vld [vmem:[#allocation2 + $0x2d0] sm:$0xff] }
  0xac   :  { %1166 = vmatprep.subr.bf16.mxu0 %v2118_v6  ;;  %1257 = vmatpush1.bf16.msra.mxu1 %v2151_v12  ;;  %v2207_v6 = vcombine.low %v200_v58, %v204_v59  ;;  %v2182_v9 = vcombine.high %v175_v4, %v179_v5  ;;  %v187_v12 = vld [vmem:[#allocation2 + $0x330] sm:$0xff]  ;;  %v2422_v58 = vld [vmem:[#allocation4 + $0xd8] sm:$0xff]  }
  0xad   :  { %1258 = vmatprep.subr.bf16.mxu1 %v2160_v48  ;;  %v2181_v48 = vcombine.low %v175_v4, %v179_v5  ;;  %v2189_v17 = vcombine.low %v183_v10, %v187_v12  ;;  %v2415_v59 = vld [vmem:[#allocation4 + $0x18] sm:$0xff]   ;;  %v2428_v4 = vld [vmem:[#allocation4 + $0xa0] sm:$0xff]  }
  0xae   :  { %v2429_v5 = vld [vmem:[#allocation4 + $0x78] sm:$0xff]  }
  0xaf   :  { %1167 = vmatpush1.bf16.msra.mxu0 %v2117_v13  ;;  %v2215_v13 = vcombine.low %v208_v2, %v212_v3  ;;  %v2426_v2 = vld [vmem:[#allocation4 + $0xe0] sm:$0xff]   ;;  %v2427_v3 = vld [vmem:[#allocation4 + $0x30] sm:$0xff]  }
  0xb0   :  { %1168 = vmatprep.subr.bf16.mxu0 %v2126_v14  ;;  %1259 = vmatpush1.bf16.msra.mxu1 %v2159_v19  ;;  %v2190_v14 = vcombine.high %v183_v10, %v187_v12  ;;  %v199_v19 = vld [vmem:[#allocation2 + $0x390] sm:$0xff]  ;;  %v2435_v12 = vld [vmem:[#allocation4 + $0xf8] sm:$0xff]  }
  0xb1   :  { %1260 = vmatprep.subr.bf16.mxu1 %v2168_v21  ;;  %v2197_v21 = vcombine.low %v191_v15, %v195_v16  ;;  %v2434_v10 = vld [vmem:[#allocation4 + $0xb0] sm:$0xff]  }
  0xb3   :  { %1169 = vmatpush1.bf16.msra.mxu0 %v2125_v20  ;;  %v203_v20 = vld [vmem:[#allocation2 + $0x3b0] sm:$0xff] }
  0xb4   :  { %1170 = vmatprep.subr.bf16.mxu0 %v2134_v22  ;;  %1261 = vmatpush1.bf16.msra.mxu1 %v2167_v28  ;;  %v2206_v22 = vcombine.high %v199_v19, %v203_v20  ;;  %v2205_v26 = vcombine.low %v199_v19, %v203_v20  ;;  %v215_v28 = vld [vmem:[#allocation2 + $0x410] sm:$0xff] }
  0xb5   :  { %1262 = vmatprep.subr.bf16.mxu1 %v2176_v30  ;;  %v2213_v30 = vcombine.low %v207_v24, %v211_v25 }
  0xb7   :  { %1171 = vmatpush1.bf16.msra.mxu0 %v2133_v29  ;;  %v219_v29 = vld [vmem:[#allocation2 + $0x430] sm:$0xff] }
  0xb8   :  { %1172 = vmatprep.subr.bf16.mxu0 %v2142_v31  ;;  %1263 = vmatpush1.bf16.msra.mxu1 %v2175_v37  ;;  %v2222_v31 = vcombine.high %v215_v28, %v219_v29  ;;  %v2221_v34 = vcombine.low %v215_v28, %v219_v29  ;;  %v216_v37 = vld [vmem:[#allocation2 + $0x418] sm:$0xff] }
  0xb9   :  { %1264 = vmatprep.subr.bf16.mxu1 %v2184_v39  ;;  %v985_v39 = vsel %vm971_vm0, %v2229_v36, 0 }
  0xbb   :  { %1173 = vmatpush1.bf16.msra.mxu0 %v2141_v38  ;;  %v220_v38 = vld [vmem:[#allocation2 + $0x438] sm:$0xff] }
  0xbc   :  { %1174 = vmatprep.subr.bf16.mxu0 %v2150_v40  ;;  %1265 = vmatpush1.bf16.msra.mxu1 %v2183_v45  ;;  %v2224_v40 = vcombine.high %v216_v37, %v220_v38  ;;  %v2223_v42 = vcombine.low %v216_v37, %v220_v38  ;;  %v2405_v45 = vld [vmem:[#allocation4 + $0x40] sm:$0xff]  }
  0xbd   :  { %1266 = vmatprep.subr.bf16.mxu1 %v2192_v47  ;;  %v2407_v47 = vld [vmem:[#allocation4 + $0x48] sm:$0xff]  }
  0xbf   :  { %1175 = vmatpush1.bf16.msra.mxu0 %v2149_v46  ;;  %v2406_v46 = vld [vmem:[#allocation4] sm:$0xff]  }
  0xc0   :  { %1176 = vmatprep.subr.bf16.mxu0 %v2158_v49  ;;  %1267 = vmatpush1.bf16.msra.mxu1 %v2191_v54  ;;  %v2410_v49 = vld [vmem:[#allocation4 + $0xc0] sm:$0xff]   ;;  %v2416_v54 = vld [vmem:[#allocation4 + $0x88] sm:$0xff]  }
  0xc1   :  { %1268 = vmatprep.subr.bf16.mxu1 %v2200_v56  ;;  %v2411_v56 = vld [vmem:[#allocation4 + $0x10] sm:$0xff]  }
  0xc3   :  { %1177 = vmatpush1.bf16.msra.mxu0 %v2157_v55  ;;  %v2418_v55 = vld [vmem:[#allocation4 + $0xd0] sm:$0xff]  }
  0xc4   :  { %1178 = vmatprep.subr.bf16.mxu0 %v2166_v57  ;;  %1269 = vmatpush1.bf16.msra.mxu1 %v2199_v62  ;;  %v2420_v57 = vld [vmem:[#allocation4 + $0x90] sm:$0xff]   ;;  %v2421_v62 = vld [vmem:[#allocation4 + $0x68] sm:$0xff]  }
  0xc5   :  { %1270 = vmatprep.subr.bf16.mxu1 %v2208_v0  ;;  %v2424_v0 = vld [vmem:[#allocation4 + $0x98] sm:$0xff]  }
  0xc7   :  { %1179 = vmatpush1.bf16.msra.mxu0 %v2165_v63  ;;  %v2423_v63 = vld [vmem:[#allocation4 + $0x28] sm:$0xff]  }
  0xc8   :  { %1180 = vmatprep.subr.bf16.mxu0 %v2174_v1  ;;  %1271 = vmatpush1.bf16.msra.mxu1 %v2207_v6  ;;  %v2425_v1 = vld [vmem:[#allocation4 + $0x70] sm:$0xff]   ;;  %v2430_v6 = vld [vmem:[#allocation4 + $0xe8] sm:$0xff]  }
  0xc9   :  { %1272 = vmatprep.subr.bf16.mxu1 %v2216_v8  ;;  %v2432_v8 = vld [vmem:[#allocation4 + $0xa8] sm:$0xff]  }
  0xcb   :  { %1181 = vmatpush1.bf16.msra.mxu0 %v2173_v7  ;;  %v2431_v7 = vld [vmem:[#allocation4 + $0x38] sm:$0xff]  }
  0xcc   :  { %1182 = vmatprep.subr.bf16.mxu0 %v2182_v9  ;;  %1273 = vmatpush1.bf16.msra.mxu1 %v2215_v13  ;;  %v2433_v9 = vld [vmem:[#allocation4 + $0xf0] sm:$0xff]   ;;  %v2436_v13 = vld [vmem:[#allocation4 + $0xb8] sm:$0xff]  }
  0xcd   :  { %2344 = vmatprep.subr.bf16.mxu1 %v2410_v49 }
  0xcf   :  { %1183 = vmatpush1.bf16.msra.mxu0 %v2181_v48  ;;  %1275 = vmatmul.mubr.bf16.vlgmr.msra.gmra.mrb[4].mxu1 %v2714_v11  ;;  %v2439_v48 = vld [vmem:[#allocation6 + $0x4] ss:$8 sps:$4 sm:$0xff]  }
  0xd0   :  { %1184 = vmatprep.subr.bf16.mxu0 %v2190_v14  ;;  %2345 = vmatpush3.bf16.msra.mxu1 %v2412_v50  ;;  %v227_v14 = vlaneseq }
  0xd1   :  { %2346 = vmatprep.subr.bf16.mxu1 %v2414_v52 }
  0xd2   :  { %v228_v19 = vshrl.u32 %v227_v14, 7 }
  0xd3   :  { %1185 = vmatpush1.bf16.msra.mxu0 %v2189_v17 }
  0xd4   :  { %1186 = vmatprep.subr.bf16.mxu0 %v2198_v18  ;;  %2347 = vmatpush3.bf16.msra.mxu1 %v2416_v54  ;;  %v237_v20 = vsub.s32 2, %v228_v19  ;;  %v253_v49 = vsub.s32 6, %v228_v19  ;;  %v257_v52 = vsub.s32 7, %v228_v19 }
  0xd5   :  { %2348 = vmatprep.subr.bf16.mxu1 %v2418_v55 }
  0xd7   :  { %1187 = vmatpush1.bf16.msra.mxu0 %v2197_v21  ;;  %v241_v21 = vsub.s32 3, %v228_v19 }
  0xd8   :  { %1188 = vmatprep.subr.bf16.mxu0 %v2206_v22  ;;  %2349 = vmatpush3.bf16.msra.mxu1 %v2420_v57  ;;  %v225_v22 = vld [vmem:[%s2786_s5] sm:$0xff] }
  0xd9   :  { %2350 = vmatprep.subr.bf16.mxu1 %v2422_v58  ;;  %v242_v28 = vrot.slane %v225_v22, %v241_v21  ;;  %v2443_v21 = vld [vmem:[#allocation6 + $0x20] ss:$8 sps:$4 sm:$0xff]  }
  0xdb   :  { %1189 = vmatpush1.bf16.msra.mxu0 %v2205_v26  ;;  %v238_v26 = vrot.slane %v225_v22, %v237_v20 }
  0xdc   :  { %1190 = vmatprep.subr.bf16.mxu0 %v2214_v27  ;;  %2351 = vmatpush3.bf16.msra.mxu1 %v2424_v0 }
  0xdd   :  { %2352 = vmatprep.subr.bf16.mxu1 %v2426_v2 }
  0xdf   :  { %1191 = vmatpush1.bf16.msra.mxu0 %v2213_v30 }
  0xe0   :  { %1201 = vmatprep.subr.bf16.mxu0 %v2222_v31  ;;  %2353 = vmatpush3.bf16.msra.mxu1 %v2428_v4 }
  0xe1   :  { %2354 = vmatprep.subr.bf16.mxu1 %v2430_v6  ;;  %v2437_v6 = vld [vmem:[#allocation6] ss:$8 sps:$4 sm:$0xff]  }
  0xe2   :  { %1193 = vmatmul.mubr.bf16.vlgmr.msra.gmra.mrb[8].mxu0 %v2714_v11  ;;  %v991_v11 = vsel %vm971_vm0, %v2231_v44, 0  ;;  %v245_v44 = vsub.s32 4, %v228_v19 }
  0xe3   :  { %1202 = vmatpush1.bf16.msra.mxu0 %v2221_v34  ;;  %1233 = vmatprep.mubr.bf16.mxu0 %v2613_v23 }
  0xe4   :  { %2237 = vmatprep.subr.msk.bf16.mxu0 %vm971_vm0, %v2230_v35  ;;  %2355 = vmatpush3.bf16.msra.mxu1 %v2432_v8 }
  0xe5   :  { %2356 = vmatprep.subr.bf16.mxu1 %v2433_v9 }
  0xe7   :  { %1204 = vmatpush1.bf16.msra.mxu0 %v985_v39 }
  0xe8   :  { %1283 = vmatprep.subr.bf16.mxu0 %v2224_v40  ;;  %2357 = vmatpush3.bf16.msra.mxu1 %v2434_v10  ;;  %v2442_v10 = vld [vmem:[#allocation6 + $0x14] ss:$8 sps:$4 sm:$0xff]  }
  0xe9   :  { %2358 = vmatprep.subr.bf16.mxu1 %v2435_v12 }
  0xec   :  { %2359 = vmatpush3.bf16.msra.mxu1 %v2436_v13 }
  0xee   :  { %2238 = vmatmul.mubr.msk.bf16.vlgmr.msra.gmra.mrb[8].mxu0 %vm967_vm1, %v2727_v32 }
  0xef   :  { %1284 = vmatpush1.bf16.msra.mxu0 %v2223_v42  ;;  %1315 = vmatprep.mubr.bf16.mxu0 %v2613_v23 }
  0xf0   :  { %2239 = vmatprep.subr.msk.bf16.mxu0 %vm971_vm0, %v2232_v43  ;;  %v2752_v43 = vsub.s32 0, %v228_v19 }
  0xf3   :  { %1286 = vmatpush1.bf16.msra.mxu0 %v991_v11  ;;  %v2754_v11 = vsub.s32 1, %v228_v19 }
  0xf4   :  { %2322 = vmatprep.subr.bf16.mxu0 %v2405_v45  ;;  %v249_v45 = vsub.s32 5, %v228_v19 }
  0xf5   :  { %v234_v50 = vrot.slane %v225_v22, %v2754_v11 }
  0xf6   :  { %2240 = vmatmul.mubr.msk.bf16.vlgmr.msra.gmra.mrb[12].mxu0 %vm967_vm1, %v2727_v32  ;;  %v2413_v32 = vld [vmem:[#allocation4 + $0x58] sm:$0xff]  }
  0xf7   :  { %2323 = vmatpush3.bf16.msra.mxu0 %v2406_v46  ;;  %v230_v46 = vrot.slane %v225_v22, %v2752_v43 }
  0xf8   :  { %2324 = vmatprep.subr.bf16.mxu0 %v2407_v47  ;;  %v246_v47 = vrot.slane %v225_v22, %v245_v44  ;;  %v2473_v44 = vld [vmem:[#allocation7 + $0x40] ss:$8 sps:$4 sm:$0xff]  }
  0xfb   :  { %2325 = vmatpush3.bf16.msra.mxu0 %v2408_v51  ;;  %v250_v51 = vrot.slane %v225_v22, %v249_v45  ;;  %v2478_v45 = vld [vmem:[#allocation7 + $0x54] ss:$8 sps:$4 sm:$0xff]  }
  0xfc   :  { %2326 = vmatprep.subr.bf16.mxu0 %v2409_v53 }
  0xff   :  { %2327 = vmatpush3.bf16.msra.mxu0 %v2411_v56 }
 0x100   :  { %2328 = vmatprep.subr.bf16.mxu0 %v2413_v32  ;;  %v254_v32 = vrot.slane %v225_v22, %v253_v49  ;;  %v2479_v49 = vld [vmem:[#allocation7 + $0x60] ss:$8 sps:$4 sm:$0xff]  }
 0x103   :  { %2329 = vmatpush3.bf16.msra.mxu0 %v2415_v59 }
 0x104   :  { %2330 = vmatprep.subr.bf16.mxu0 %v2417_v60  ;;  %v258_v60 = vrot.slane %v225_v22, %v257_v52  ;;  %v2487_v52 = vld [vmem:[#allocation7 + $0x84] ss:$8 sps:$4 sm:$0xff]  }
 0x107   :  { %2331 = vmatpush3.bf16.msra.mxu0 %v2419_v61 }
 0x108   :  { %2332 = vmatprep.subr.bf16.mxu0 %v2421_v62 }
 0x10b   :  { %2333 = vmatpush3.bf16.msra.mxu0 %v2423_v63 }
 0x10c   :  { %2334 = vmatprep.subr.bf16.mxu0 %v2425_v1 }
 0x10f   :  { %2335 = vmatpush3.bf16.msra.mxu0 %v2427_v3 }
 0x110   :  { %2336 = vmatprep.subr.bf16.mxu0 %v2429_v5 }
 0x113   :  { %2337 = vmatpush3.bf16.msra.mxu0 %v2431_v7 }
 0x114   :  { %1789 = vmatprep.subr.bf16.mxu0 %v2439_v48 }
 0x161   :  { %v1112_v15 = vpop.f32.mrb[0].mxu1 }
 0x162   :  { %v1114_v16 = vpop.f32.mrb[1].mxu1  ;;  %v1113_v30 = vadd.f32 %v1112_v15, %v238_v26  ;;  %v2451_v26 = vld [vmem:[#allocation6 + $0x44] ss:$8 sps:$4 sm:$0xff]  }
 0x163   :  { %v1116_v17 = vpop.f32.mrb[2].mxu1  ;;  %v1115_v31 = vadd.f32 %v1114_v16, %v242_v28  ;;  %v2440_v16 = vld [vmem:[#allocation6 + $0x10] ss:$8 sps:$4 sm:$0xff]   ;;  %v2454_v28 = vld [vmem:[#allocation6 + $0x54] ss:$8 sps:$4 sm:$0xff]  }
 0x164   :  { %v1117_v18 = vpop.f32.mrb[3].mxu1 }
 0x165   :  { %v2445_v18 = vld [vmem:[#allocation6 + $0x24] ss:$8 sps:$4 sm:$0xff]  }
 0x16d   :  { %v1071_v24 = vpop.f32.mrb[0].mxu0 }
 0x16e   :  { %v1073_v25 = vpop.f32.mrb[1].mxu0  ;;  %v2366_v54 = vadd.f32 %v1071_v24, %v230_v46  ;;  %v2448_v24 = vld [vmem:[#allocation6 + $0x34] ss:$8 sps:$4 sm:$0xff]   ;;  %v2476_v46 = vld [vmem:[#allocation7 + $0x50] ss:$8 sps:$4 sm:$0xff]  }
 0x16f   :  { %v1075_v27 = vpop.f32.mrb[2].mxu0  ;;  %v2367_v57 = vadd.f32 %v1073_v25, %v234_v50  ;;  %v2446_v25 = vld [vmem:[#allocation6 + $0x30] ss:$8 sps:$4 sm:$0xff]   ;;  %v2484_v50 = vld [vmem:[#allocation7 + $0x74] ss:$8 sps:$4 sm:$0xff]  }
 0x170   :  { %v1076_v29 = vpop.f32.mrb[3].mxu0  ;;  %v2449_v27 = vld [vmem:[#allocation6 + $0x40] ss:$8 sps:$4 sm:$0xff]  }
 0x171   :  { %v2457_v29 = vld [vmem:[#allocation6 + $0x64] ss:$8 sps:$4 sm:$0xff]  }
 0x175   :  { %v1153_v33 = vpop.f32.mrb[4].mxu0 }
 0x176   :  { %v1154_v34 = vadd.f32 %v1153_v33, %v1113_v30  ;;  %v1155_v35 = vpop.f32.mrb[5].mxu0  ;;  %v2455_v30 = vld [vmem:[#allocation6 + $0x60] ss:$8 sps:$4 sm:$0xff]   ;;  %v2458_v33 = vld [vmem:[#allocation6 + $0x70] ss:$8 sps:$4 sm:$0xff]  }
 0x177   :  { %v1156_v36 = vadd.f32 %v1155_v35, %v1115_v31  ;;  %v1157_v37 = vpop.f32.mrb[6].mxu0  ;;  %v2460_v31 = vld [vmem:[#allocation6 + $0x74] ss:$8 sps:$4 sm:$0xff]   ;;  %v2463_v35 = vld [vmem:[#allocation7 + $0x4] ss:$8 sps:$4 sm:$0xff]  }
 0x178   :  { %v1158_v38 = vpop.f32.mrb[7].mxu0  ;;  %2038 = vmatprep.subr.bf16.mxu1 %v2463_v35  ;;  %v2464_v37 = vld [vmem:[#allocation7 + $0x10] ss:$8 sps:$4 sm:$0xff]  }
 0x179   :  { %v2469_v38 = vld [vmem:[#allocation7 + $0x24] ss:$8 sps:$4 sm:$0xff]  }
 0x1a2   :  { %v1276_v39 = vpop.f32.mrb[4].mxu1 }
 0x1a3   :  { %v1278_v40 = vpop.f32.mrb[5].mxu1  ;;  %v1277_v1 = vadd.f32 %v1276_v39, %v254_v32  ;;  %v2467_v39 = vld [vmem:[#allocation7 + $0x20] ss:$8 sps:$4 sm:$0xff]  }
 0x1a4   :  { %v1280_v41 = vpop.f32.mrb[6].mxu1  ;;  %v1279_v3 = vadd.f32 %v1278_v40, %v258_v60  ;;  %v2472_v40 = vld [vmem:[#allocation7 + $0x34] ss:$8 sps:$4 sm:$0xff]   ;;  %v2491_v32 = vld [vmem:[#allocation7 + $0xa0] ss:$8 sps:$4 sm:$0xff]  }
 0x1a5   :  { %v1281_v42 = vpop.f32.mrb[7].mxu1  ;;  %v2470_v41 = vld [vmem:[#allocation7 + $0x30] ss:$8 sps:$4 sm:$0xff]   ;;  %v2497_v60 = vld [vmem:[#allocation7 + $0xc0] ss:$8 sps:$4 sm:$0xff]  }
 0x1a6   :  { %v2475_v42 = vld [vmem:[#allocation7 + $0x44] ss:$8 sps:$4 sm:$0xff]  }
 0x1c1   :  { %v1235_v53 = vpop.f32.mrb[8].mxu0 }
 0x1c2   :  { %v2372_v55 = vadd.f32 %v1235_v53, %v246_v47  ;;  %v1237_v56 = vpop.f32.mrb[9].mxu0  ;;  %v2481_v47 = vld [vmem:[#allocation7 + $0x64] ss:$8 sps:$4 sm:$0xff]   ;;  %v2485_v53 = vld [vmem:[#allocation7 + $0x80] ss:$8 sps:$4 sm:$0xff]  }
 0x1c3   :  { %v2373_v58 = vadd.f32 %v1237_v56, %v250_v51  ;;  %v1239_v59 = vpop.f32.mrb[10].mxu0  ;;  %v2482_v51 = vld [vmem:[#allocation7 + $0x70] ss:$8 sps:$4 sm:$0xff]   ;;  %v2493_v56 = vld [vmem:[#allocation7 + $0xa4] ss:$8 sps:$4 sm:$0xff]  }
 0x1c4   :  { %v1324_v61 = vmax.f32 %v2366_v54, %v2372_v55  ;;  %v1240_v62 = vpop.f32.mrb[11].mxu0  ;;  %v2490_v54 = vld [vmem:[#allocation7 + $0x94] ss:$8 sps:$4 sm:$0xff]   ;;  %v2488_v55 = vld [vmem:[#allocation7 + $0x90] ss:$8 sps:$4 sm:$0xff]  }
 0x1c5   :  { %v1325_v63 = vmax.f32 %v2367_v57, %v2373_v58  ;;  %v2496_v57 = vld [vmem:[#allocation7 + $0xb4] ss:$8 sps:$4 sm:$0xff]   ;;  %v2494_v58 = vld [vmem:[#allocation7 + $0xb0] ss:$8 sps:$4 sm:$0xff]   ;;  %v2499_v59 = vld [vmem:[#allocation7 + $0xc4] ss:$8 sps:$4 sm:$0xff]  }
 0x1c6   :  { %v1328_v0 = vmax.f32 %v1324_v61, 0.0  ;;  %v2502_v61 = vld [vmem:[#allocation7 + $0xd4] ss:$8 sps:$4 sm:$0xff]   ;;  %v2500_v62 = vld [vmem:[#allocation7 + $0xd0] ss:$8 sps:$4 sm:$0xff]  }
 0x1c7   :  { %v1329_v2 = vmax.f32 %v1325_v63, 0.0 }
 0x1c8   :  { %v1332_v7 = vpack.c.bf16 %v1328_v0, %v1328_v0 }
 0x1c9   :  { %v1333_v4 = vpack.c.bf16 %v1329_v2, %v1329_v2  ;;  %v1317_v5 = vpop.f32.mrb[12].mxu0 }
 0x1ca   :  { %v1318_v8 = vadd.f32 %v1317_v5, %v1277_v1  ;;  %v1319_v9 = vpop.f32.mrb[13].mxu0 }
 0x1cb   :  { %v1320_v12 = vadd.f32 %v1319_v9, %v1279_v3  ;;  %v1321_v13 = vpop.f32.mrb[14].mxu0  ;;  %1631 = vmatprep.mubr.bf16.mxu0 %v1333_v4  ;;  %v2241_v4 = vld [vmem:[%s2786_s5 + $0x8] ss:$0 sm:$0xff] }
 0x1cc   :  { %v1326_v48 = vmax.f32 %v1154_v34, %v1318_v8  ;;  %v1322_v14 = vpop.f32.mrb[15].mxu0  ;;  %1632 = vmatmul.mubr.bf16.vlgmr.msra.gmra.mrb[16].mxu0 %v1332_v7  ;;  %v2461_v34 = vld [vmem:[#allocation7] ss:$8 sps:$4 sm:$0xff]  }
 0x1cd   :  { %v1327_v15 = vmax.f32 %v1156_v36, %v1320_v12  ;;  %1790 = vmatpush1.bf16.msra.mxu0 %v2437_v6  ;;  %1821 = vmatprep.mubr.bf16.mxu0 %v2613_v23  ;;  %v2452_v23 = vld [vmem:[#allocation6 + $0x50] ss:$8 sps:$4 sm:$0xff]   ;;  %v2466_v36 = vld [vmem:[#allocation7 + $0x14] ss:$8 sps:$4 sm:$0xff]   ;;  %v2505_v14 = vld [vmem:[#allocation7 + $0xe4] ss:$8 sps:$4 sm:$0xff]  }
 0x1ce   :  { %v1330_v17 = vmax.f32 %v1326_v48, 0.0  ;;  %1791 = vmatprep.subr.bf16.mxu0 %v2442_v10 }
 0x1cf   :  { %v1331_v19 = vmax.f32 %v1327_v15, 0.0  ;;  %v2503_v15 = vld [vmem:[#allocation7 + $0xe0] ss:$8 sps:$4 sm:$0xff]  }
 0x1d0   :  { %v1334_v22 = vpack.c.bf16 %v1330_v17, %v1330_v17  ;;  %v2506_v17 = vld [vmem:[#allocation7 + $0xf0] ss:$8 sps:$4 sm:$0xff]  }
 0x1d1   :  { %v1335_v20 = vpack.c.bf16 %v1331_v19, %v1331_v19  ;;  %1792 = vmatpush1.bf16.msra.mxu0 %v2440_v16  ;;  %v2508_v16 = vld [vmem:[#allocation7 + $0xf4] ss:$8 sps:$4 sm:$0xff]  }
 0x1d2   :  { %1793 = vmatprep.subr.bf16.mxu0 %v2445_v18  ;;  %v1697_v18 = vld [vmem:[%s2786_s5 + $0x9] sm:$0x3] }
 0x1d3   :  { %1671 = vmatprep.mubr.bf16.mxu1 %v1335_v20  ;;  %v1702_v19 = vrot.slane %v1697_v18, %v2752_v43  ;;  %v1706_v20 = vrot.slane %v1697_v18, %v2754_v11 }
 0x1d4   :  { %1672 = vmatmul.mubr.bf16.vlgmr.msra.gmra.mrb[8].mxu1 %v1334_v22 }
 0x1d5   :  { %1794 = vmatpush1.bf16.msra.mxu0 %v2443_v21  ;;  %2039 = vmatpush1.bf16.msra.mxu1 %v2461_v34 }
 0x1d6   :  { %1795 = vmatprep.subr.bf16.mxu0 %v2448_v24  ;;  %2040 = vmatprep.subr.bf16.mxu1 %v2466_v36 }
 0x1d9   :  { %1796 = vmatpush1.bf16.msra.mxu0 %v2446_v25  ;;  %2041 = vmatpush1.bf16.msra.mxu1 %v2464_v37 }
 0x1da   :  { %1797 = vmatprep.subr.bf16.mxu0 %v2451_v26  ;;  %2042 = vmatprep.subr.bf16.mxu1 %v2469_v38 }
 0x1dd   :  { %1798 = vmatpush1.bf16.msra.mxu0 %v2449_v27  ;;  %2043 = vmatpush1.bf16.msra.mxu1 %v2467_v39 }
 0x1de   :  { %1799 = vmatprep.subr.bf16.mxu0 %v2454_v28  ;;  %2044 = vmatprep.subr.bf16.mxu1 %v2472_v40 }
 0x1e1   :  { %1800 = vmatpush1.bf16.msra.mxu0 %v2452_v23  ;;  %2045 = vmatpush1.bf16.msra.mxu1 %v2470_v41 }
 0x1e2   :  { %1801 = vmatprep.subr.bf16.mxu0 %v2457_v29  ;;  %2046 = vmatprep.subr.bf16.mxu1 %v2475_v42 }
 0x1e5   :  { %1802 = vmatpush1.bf16.msra.mxu0 %v2455_v30  ;;  %2047 = vmatpush1.bf16.msra.mxu1 %v2473_v44 }
 0x1e6   :  { %1803 = vmatprep.subr.bf16.mxu0 %v2460_v31  ;;  %2048 = vmatprep.subr.bf16.mxu1 %v2478_v45  ;;  %v1866_v31 = vld [vmem:[%s2786_s5 + $0xb] sm:$0x3] }
 0x1e7   :  { %v1875_v34 = vrot.slane %v1866_v31, %v2754_v11 }
 0x1e9   :  { %1804 = vmatpush1.bf16.msra.mxu0 %v2458_v33  ;;  %2049 = vmatpush1.bf16.msra.mxu1 %v2476_v46  ;;  %v1871_v33 = vrot.slane %v1866_v31, %v2752_v43 }
 0x1ea   :  { %2050 = vmatprep.subr.bf16.mxu1 %v2481_v47 }
 0x1ed   :  { %2051 = vmatpush1.bf16.msra.mxu1 %v2479_v49 }
 0x1ee   :  { %2052 = vmatprep.subr.bf16.mxu1 %v2484_v50 }
 0x1f1   :  { %2053 = vmatpush1.bf16.msra.mxu1 %v2482_v51 }
 0x1f2   :  { %2054 = vmatprep.subr.bf16.mxu1 %v2487_v52 }
 0x1f5   :  { %2055 = vmatpush1.bf16.msra.mxu1 %v2485_v53 }
 0x1f6   :  { %2056 = vmatprep.subr.bf16.mxu1 %v2490_v54 }
 0x1f9   :  { %2057 = vmatpush1.bf16.msra.mxu1 %v2488_v55 }
 0x1fa   :  { %2058 = vmatprep.subr.bf16.mxu1 %v2493_v56 }
 0x1fd   :  { %2059 = vmatpush1.bf16.msra.mxu1 %v2491_v32 }
 0x1fe   :  { %2060 = vmatprep.subr.bf16.mxu1 %v2496_v57 }
 0x201   :  { %2061 = vmatpush1.bf16.msra.mxu1 %v2494_v58 }
 0x202   :  { %2062 = vmatprep.subr.bf16.mxu1 %v2499_v59 }
 0x205   :  { %2063 = vmatpush1.bf16.msra.mxu1 %v2497_v60 }
 0x206   :  { %2064 = vmatprep.subr.bf16.mxu1 %v2502_v61 }
 0x209   :  { %2065 = vmatpush1.bf16.msra.mxu1 %v2500_v62 }
 0x20a   :  { %2066 = vmatprep.subr.bf16.mxu1 %v2505_v14 }
 0x20d   :  { %2067 = vmatpush1.bf16.msra.mxu1 %v2503_v15 }
 0x20e   :  { %2068 = vmatprep.subr.bf16.mxu1 %v2508_v16 }
 0x211   :  { %2069 = vmatpush1.bf16.msra.mxu1 %v2506_v17 }
 0x29f   :  { %v2338_v63 = vpop.f32.mrb[16].mxu0 }
 0x2a0   :  { %v2339_v0 = vpop.f32.mrb[17].mxu0 }
 0x2a1   :  { %v2340_v1 = vadd.f32 %v2339_v0, %v2338_v63  ;;  %v2341_v2 = vpop.f32.mrb[18].mxu0 }
 0x2a2   :  { %v2342_v3 = vpop.f32.mrb[19].mxu0 }
 0x2a3   :  { %v1634_v7 = vadd.f32 %v2340_v1, %v2241_v4 }
 0x2a7   :  { %v2360_v5 = vpop.f32.mrb[8].mxu1 }
 0x2a8   :  { %v2361_v6 = vpop.f32.mrb[9].mxu1 }
 0x2a9   :  { %v2362_v8 = vadd.f32 %v2361_v6, %v2360_v5  ;;  %v2363_v9 = vpop.f32.mrb[10].mxu1 }
 0x2aa   :  { %v2364_v10 = vpop.f32.mrb[11].mxu1 }
 0x2ab   :  { %v1674_v12 = vadd.f32 %v2362_v8, %v1634_v7 }
 0x2ad   :  { %v1679_v13 = vmax.f32 %v1674_v12, 0.0 }
 0x2af   :  { %v1680_v48 = vpack.c.bf16 %v1679_v13, %v1679_v13  ;;  %2079 = vst [vmem:[%s2787_s6] sm:$0xff] %v1679_v13 }
 0x2b1   :  { %1822 = vmatmul.mubr.bf16.vlgmr.msra.gmra.mrb[20].mxu0 %v1680_v48 }
 0x384   :  { %v1823_v21 = vpop.f32.mrb[20].mxu0 }
 0x385   :  { %v1824_v22 = vadd.f32 %v1823_v21, %v1702_v19  ;;  %v1825_v24 = vpop.f32.mrb[21].mxu0 }
 0x386   :  { %v1826_v25 = vadd.f32 %v1825_v24, %v1706_v20  ;;  %v1827_v26 = vpop.f32.mrb[22].mxu0 }
 0x387   :  { %v1830_v27 = vmax.f32 %v1824_v22, 0.0  ;;  %v1828_v23 = vpop.f32.mrb[23].mxu0 }
 0x388   :  { %v1831_v28 = vmax.f32 %v1826_v25, 0.0 }
 0x389   :  { %v1832_v30 = vpack.c.bf16 %v1830_v27, %v1830_v27 }
 0x38a   :  { %v1833_v29 = vpack.c.bf16 %v1831_v28, %v1831_v28 }
 0x38c   :  { %2070 = vmatprep.mubr.bf16.mxu1 %v1833_v29 }
 0x38d   :  { %2071 = vmatmul.mubr.bf16.vlgmr.msra.gmra.mrb[12].mxu1 %v1832_v30 }
 0x460   :  { %v2072_v35 = vpop.f32.mrb[12].mxu1 }
 0x461   :  { %v2073_v36 = vadd.f32 %v2072_v35, %v1871_v33  ;;  %v2074_v37 = vpop.f32.mrb[13].mxu1 }
 0x462   :  { %v2075_v38 = vadd.f32 %v2074_v37, %v1875_v34  ;;  %v2076_v39 = vpop.f32.mrb[14].mxu1 }
 0x463   :  { %2080 = vst [vmem:[%s2787_s6 + $0x8] sm:$0xff] %v2073_v36  ;;  %v2077_v40 = vpop.f32.mrb[15].mxu1 }
 0x464   :  { %2081 = vst [vmem:[%s2787_s6 + $0x10] sm:$0xff] %v2075_v38 }
 0x465   :  { %2086 = vsyncpa [#allocation3], 1 }
 0x466   :  { %2087 = vsyncpa [#allocation5], 1 }
 0x467   :  { %2088 = vsyncpa [#allocation8], 1 }

</bundles_post_ra>
